<compile_context>
chip_gen: v7x
topology: tpu7x:2x2x1
jax: 0.10.0
libtpu: 0.0.40
codegen_flags: <defaults>
</compile_context>

<pallas_src>
import functools
import math
import random

import jax
import jax.numpy as jnp
from jax.experimental import pallas as pl
from jax.experimental.pallas import tpu as pltpu

W_DIM = 256          # latent / style dimension (fixed by MappingNetwork)
LRELU_SLOPE = 0.2
RGB_PAD = 128        # to_rgb Cout padded 3 -> 128 for lane-dense MXU/stores
_MB = 1024 * 1024


def _vmem_limit(nbytes):
    # Generous headroom, floored at the v6e default and capped below v7x's
    # 64 MiB physical VMEM.
    return int(min(max(2 * nbytes, 32 * _MB), 48 * _MB))


# ----------------------------------------------------------------------------
# Mapping network: PixelNorm + 8 x (EqualLRLinear(256,256) -> LeakyReLU(0.2))
# ----------------------------------------------------------------------------

def _mapping_kernel(z_ref, w_ref, b_ref, o_ref):
    x = z_ref[...]                                           # (B, 256) f32
    # PixelNorm: x / sqrt(mean(x^2, dim=1) + 1e-8)
    x = x * jax.lax.rsqrt(jnp.mean(x * x, axis=1, keepdims=True) + 1e-8)
    for i in range(8):                                       # static unroll
        h = jnp.dot(x.astype(w_ref.dtype), w_ref[i],
                    preferred_element_type=jnp.float32) + b_ref[i]
        x = jnp.where(h >= 0, h, LRELU_SLOPE * h)
    o_ref[...] = x


def mapping_forward(z, w_stack, b_stack):
    # z: (B, 256) f32; w_stack: (8, 256, 256) bf16; b_stack: (8, 1, 256) f32
    return pl.pallas_call(
        _mapping_kernel,
        out_shape=jax.ShapeDtypeStruct(z.shape, jnp.float32),
        compiler_params=pltpu.CompilerParams(vmem_limit_bytes=32 * _MB),
    )(z, w_stack, b_stack)


# ----------------------------------------------------------------------------
# 3x3 conv (pad=1) + bias + LeakyReLU, per-tap whole-tile matmuls
# ----------------------------------------------------------------------------

def _conv3x3_kernel(x_ref, w_ref, b_ref, o_ref, acc_ref, *,
                    TILE_H, W, Wp, KH, KW, L, lrelu):
    """One output row-tile of a 3x3 conv: one big matmul per (kh, kw) tap.

    x_ref:   (1, Hp*Wp, Cin)  whole padded sample, flattened (resident per n)
    w_ref:   (KH*KW, Cin, Cout) bf16 (equalized-LR scale pre-folded)
    b_ref:   (1, Cout) f32
    o_ref:   (1, TILE_H*W, Cout) f32
    acc_ref: VMEM (L, Cout) f32 scratch, L = (TILE_H-1)*Wp + W

    Output pixel (h, w) of the tile sits at accumulator index h*Wp + w; the
    (Wp - W) trailing columns of each row are padding garbage never stored.
    """
    row0 = pl.program_id(1) * TILE_H
    first = True
    for kh in range(KH):
        for kw in range(KW):
            start = (row0 + kh) * Wp + kw
            patch = x_ref[0, pl.ds(start, L), :]             # (L, Cin) f32
            contrib = jnp.dot(patch.astype(w_ref.dtype), w_ref[kh * KW + kw],
                              preferred_element_type=jnp.float32)
            if first:
                acc_ref[...] = contrib
                first = False
            else:
                acc_ref[...] += contrib
    res = acc_ref[...] + b_ref[...]
    if lrelu:
        res = jnp.where(res >= 0, res, LRELU_SLOPE * res)
    for h in range(TILE_H):                                  # drop pad columns
        o_ref[0, pl.ds(h * W, W), :] = res[h * Wp:h * Wp + W, :]


def _pick_tile_h(H, W, Cout, budget_bytes=4 * _MB):
    # accumulator + double-buffered output tile ~ 3 * TILE_H * Wp * Cout * 4
    tile = H
    while tile > 1 and 3 * tile * (W + 2) * Cout * 4 > budget_bytes:
        tile //= 2
    return tile


def conv3x3_forward(x, w, b, *, lrelu=True):
    # x: (N, H, W, Cin) f32; w: (3, 3, Cin, Cout) bf16; b: (1, Cout) f32
    N, H, W, Cin = x.shape
    KH, KW, _, Cout = w.shape
    pad = 1
    # TODO(synk): at 128/256 res, replace whole-sample-resident input with a
    # manually halo-DMA'd row window (memory_space=pl.ANY) to cut VMEM.
    xp = jnp.pad(x, ((0, 0), (pad, pad), (pad, pad), (0, 0)))
    Hp, Wp = H + 2 * pad, W + 2 * pad
    x_flat = xp.reshape(N, Hp * Wp, Cin)
    w_flat = w.reshape(KH * KW, Cin, Cout)

    TILE_H = _pick_tile_h(H, W, Cout)
    num_t = H // TILE_H
    L = (TILE_H - 1) * Wp + W

    nbytes = (2 * Hp * Wp * Cin * 4           # input sample (double-buffered)
              + 2 * TILE_H * W * Cout * 4     # output tile (double-buffered)
              + 2 * KH * KW * Cin * Cout * 2  # bf16 weights
              + L * Cout * 4 + Cout * 4)      # accumulator + bias

    kern = functools.partial(_conv3x3_kernel, TILE_H=TILE_H, W=W, Wp=Wp,
                             KH=KH, KW=KW, L=L, lrelu=lrelu)
    out_flat = pl.pallas_call(
        kern,
        out_shape=jax.ShapeDtypeStruct((N, H * W, Cout), jnp.float32),
        grid=(N, num_t),
        in_specs=[
            pl.BlockSpec((1, Hp * Wp, Cin), lambda n, t: (n, 0, 0)),
            pl.BlockSpec((KH * KW, Cin, Cout), lambda n, t: (0, 0, 0)),
            pl.BlockSpec((1, Cout), lambda n, t: (0, 0)),
        ],
        out_specs=pl.BlockSpec((1, TILE_H * W, Cout), lambda n, t: (n, t, 0)),
        scratch_shapes=[pltpu.VMEM((L, Cout), jnp.float32)],
        compiler_params=pltpu.CompilerParams(
            dimension_semantics=("parallel", "arbitrary"),
            vmem_limit_bytes=_vmem_limit(nbytes)),
    )(x_flat, w_flat, b)
    return out_flat.reshape(N, H, W, Cout)


# ----------------------------------------------------------------------------
# AdaIN with the style affine (EqualLRLinear(256, 2C)) fused in
# ----------------------------------------------------------------------------

def _adain_kernel(x_ref, wlat_ref, sw_ref, sb_ref, o_ref):
    C = o_ref.shape[-1]
    style = jnp.dot(wlat_ref[0].astype(sw_ref.dtype), sw_ref[...],
                    preferred_element_type=jnp.float32) + sb_ref[...]   # (1, 2C)
    scale = style[:, :C]
    shift = style[:, C:]
    x = x_ref[0]                                             # (HW, C)
    mean = jnp.mean(x, axis=0, keepdims=True)
    xc = x - mean
    var = jnp.mean(xc * xc, axis=0, keepdims=True)
    xn = xc * jax.lax.rsqrt(var + 1e-5)                      # InstanceNorm2d eps
    o_ref[0] = scale * xn + shift


def adain_forward(x, w_lat, style_w, style_b):
    # x: (N, H, W, C); w_lat: (N, 256); style_w: (256, 2C) bf16; style_b: (1, 2C)
    # TODO(synk): at 128/256 res, split into a tiled stats pass + apply pass.
    N, H, W, C = x.shape
    x_flat = x.reshape(N, H * W, C)
    wlat3 = w_lat.reshape(N, 1, W_DIM)
    nbytes = 4 * H * W * C * 4 + W_DIM * 2 * C * 2 + 2 * C * 4
    out = pl.pallas_call(
        _adain_kernel,
        out_shape=jax.ShapeDtypeStruct((N, H * W, C), jnp.float32),
        grid=(N,),
        in_specs=[
            pl.BlockSpec((1, H * W, C), lambda n: (n, 0, 0)),
            pl.BlockSpec((1, 1, W_DIM), lambda n: (n, 0, 0)),
            pl.BlockSpec((W_DIM, 2 * C), lambda n: (0, 0)),
            pl.BlockSpec((1, 2 * C), lambda n: (0, 0)),
        ],
        out_specs=pl.BlockSpec((1, H * W, C), lambda n: (n, 0, 0)),
        compiler_params=pltpu.CompilerParams(
            dimension_semantics=("parallel",),
            vmem_limit_bytes=_vmem_limit(nbytes)),
    )(x_flat, wlat3, style_w, style_b)
    return out.reshape(N, H, W, C)


# ----------------------------------------------------------------------------
# to_rgb (1x1 conv, Cout padded 3->128) with fused blend + tanh epilogues
# ----------------------------------------------------------------------------

def _rgb_kernel(x_ref, w_ref, b_ref, o_ref):
    o_ref[0] = jnp.dot(x_ref[0].astype(w_ref.dtype), w_ref[...],
                       preferred_element_type=jnp.float32) + b_ref[...]


def _rgb_tanh_kernel(x_ref, w_ref, b_ref, o_ref):
    rgb = jnp.dot(x_ref[0].astype(w_ref.dtype), w_ref[...],
                  preferred_element_type=jnp.float32) + b_ref[...]
    o_ref[0] = jnp.tanh(rgb)


def _rgb_blend_tanh_kernel(x_ref, w_ref, b_ref, skip_ref, o_ref, *, alpha):
    rgb = jnp.dot(x_ref[0].astype(w_ref.dtype), w_ref[...],
                  preferred_element_type=jnp.float32) + b_ref[...]
    o_ref[0] = jnp.tanh((1.0 - alpha) * skip_ref[0] + alpha * rgb)


def _rgb_call(kernel, x, w_pad, b_pad, extra=(), extra_specs=()):
    N, H, W, Cin = x.shape
    x_flat = x.reshape(N, H * W, Cin)
    nbytes = 2 * H * W * (Cin + 3 * RGB_PAD) * 4 + Cin * RGB_PAD * 2
    out = pl.pallas_call(
        kernel,
        out_shape=jax.ShapeDtypeStruct((N, H * W, RGB_PAD), jnp.float32),
        grid=(N,),
        in_specs=[pl.BlockSpec((1, H * W, Cin), lambda n: (n, 0, 0)),
                  pl.BlockSpec((Cin, RGB_PAD), lambda n: (0, 0)),
                  pl.BlockSpec((1, RGB_PAD), lambda n: (0, 0)),
                  *extra_specs],
        out_specs=pl.BlockSpec((1, H * W, RGB_PAD), lambda n: (n, 0, 0)),
        compiler_params=pltpu.CompilerParams(
            dimension_semantics=("parallel",),
            vmem_limit_bytes=_vmem_limit(nbytes)),
    )(x_flat, w_pad, b_pad, *extra)
    return out.reshape(N, H, W, RGB_PAD)


def to_rgb_raw(x, rgb_params):
    # Lane-padded RGB (channels 3..127 are exactly zero).
    return _rgb_call(_rgb_kernel, x, rgb_params["w"], rgb_params["b"])


def to_rgb_tanh(x, rgb_params):
    out = _rgb_call(_rgb_tanh_kernel, x, rgb_params["w"], rgb_params["b"])
    return out[..., :3]


def to_rgb_blend_tanh(x, rgb_params, skip_pad, alpha):
    N, H, W, _ = x.shape
    skip_flat = skip_pad.reshape(N, H * W, RGB_PAD)
    kern = functools.partial(_rgb_blend_tanh_kernel, alpha=float(alpha))
    out = _rgb_call(kern, x, rgb_params["w"], rgb_params["b"],
                    extra=(skip_flat,),
                    extra_specs=(pl.BlockSpec((1, H * W, RGB_PAD),
                                              lambda n: (n, 0, 0)),))
    return out[..., :3]


# ----------------------------------------------------------------------------
# Upsampling glue (layout plumbing)
# ----------------------------------------------------------------------------

def upsample_nearest_2x(x):
    # TODO(synk): fold the nearest-2x read into the conv input DMA instead of
    # materializing the 4x-larger tensor in HBM (mem-bound at 128/256 res).
    return jnp.repeat(jnp.repeat(x, 2, axis=1), 2, axis=2)


# ----------------------------------------------------------------------------
# Parameter init (deterministic, equalized-LR scale folded in, bf16 weights)
# ----------------------------------------------------------------------------

def _init_conv3x3(key, cin, cout):
    scale = math.sqrt(2.0 / (cin * 9))
    w = (jax.random.normal(key, (3, 3, cin, cout), jnp.float32) * scale
         ).astype(jnp.bfloat16)
    return {"w": w, "b": jnp.zeros((1, cout), jnp.float32)}


def _init_rgb(key, cin):
    scale = math.sqrt(2.0 / cin)
    w3 = jax.random.normal(key, (cin, 3), jnp.float32) * scale
    w = jnp.zeros((cin, RGB_PAD), jnp.float32).at[:, :3].set(w3).astype(jnp.bfloat16)
    return {"w": w, "b": jnp.zeros((1, RGB_PAD), jnp.float32)}


def _init_style(key, cout):
    # TODO(synk): G_ConvBlock/AdaIN affine not shipped; standard StyleGAN init
    # (scale-bias = 1, shift-bias = 0), equalized-LR scale folded in.
    scale = math.sqrt(2.0 / W_DIM)
    w = (jax.random.normal(key, (W_DIM, 2 * cout), jnp.float32) * scale
         ).astype(jnp.bfloat16)
    b = jnp.concatenate([jnp.ones((1, cout), jnp.float32),
                         jnp.zeros((1, cout), jnp.float32)], axis=1)
    return {"w": w, "b": b}


def _init_block(key, cin, cout, first=False):
    k1, k2, k3, k4, k5 = jax.random.split(key, 5)
    blk = {"conv1": _init_conv3x3(k1, cin, cout),
           "conv2": _init_conv3x3(k2, cout, cout),
           "style1": _init_style(k3, cout),
           "style2": _init_style(k4, cout)}
    if first:
        blk["const"] = jax.random.normal(k5, (1, 4, 4, cin), jnp.float32)
    return blk


def init_params(key, in_c=256):
    keys = jax.random.split(key, 32)
    ki = iter(keys)
    params = {}

    scale = math.sqrt(2.0 / W_DIM)
    ws, bs = [], []
    for _ in range(8):
        ws.append(jax.random.normal(next(ki), (W_DIM, W_DIM), jnp.float32) * scale)
        bs.append(jnp.zeros((1, W_DIM), jnp.float32))
    params["mapping_w"] = jnp.stack(ws).astype(jnp.bfloat16)   # (8, 256, 256)
    params["mapping_b"] = jnp.stack(bs)                        # (8, 1, 256)

    block_io = [(in_c, in_c), (in_c, in_c), (in_c, in_c), (in_c, in_c),
                (in_c, in_c // 2), (in_c // 2, in_c // 4), (in_c // 4, in_c // 4)]
    block_names = ["block_4x4", "block_8x8", "block_16x16", "block_32x32",
                   "block_64x64", "block_128x128", "block_256x256"]
    for i, (name, (cin, cout)) in enumerate(zip(block_names, block_io)):
        params[name] = _init_block(next(ki), cin, cout, first=(i == 0))

    rgb_cins = [in_c, in_c, in_c, in_c, in_c // 2, in_c // 4, in_c // 4]
    rgb_names = ["to_rgb_4", "to_rgb_8", "to_rgb_16", "to_rgb_32",
                 "to_rgb_64", "to_rgb_128", "to_rgb_256"]
    for name, cin in zip(rgb_names, rgb_cins):
        params[name] = _init_rgb(next(ki), cin)
    return params


# ----------------------------------------------------------------------------
# Generator forward
# ----------------------------------------------------------------------------

def g_conv_block(blk, w_lat, x=None, first=False):
    # TODO(synk): G_ConvBlock definition not shipped; standard StyleGAN block
    # assumed (const/upsample -> [conv3x3 -> lrelu -> AdaIN(w)] x 2); per-pixel
    # noise injection omitted (non-deterministic).
    if first:
        N = w_lat.shape[0]
        x = jnp.broadcast_to(blk["const"], (N,) + blk["const"].shape[1:])
    else:
        x = upsample_nearest_2x(x)
    for conv_name, style_name in (("conv1", "style1"), ("conv2", "style2")):
        x = conv3x3_forward(x, blk[conv_name]["w"], blk[conv_name]["b"], lrelu=True)
        x = adain_forward(x, w_lat, blk[style_name]["w"], blk[style_name]["b"])
    return x


def generator_forward(params, z, layer_num, alpha, mix_key, py_rng):
    B = z.shape[0]
    block_names = ["block_4x4", "block_8x8", "block_16x16", "block_32x32",
                   "block_64x64", "block_128x128", "block_256x256"]
    rgb_names = ["to_rgb_4", "to_rgb_8", "to_rgb_16", "to_rgb_32",
                 "to_rgb_64", "to_rgb_128", "to_rgb_256"]

    # Style mixing (torch.rand / random.randint replicated with host RNG);
    # z and z2 batched through a single mapping call.
    if py_rng.random() < 0.9:
        z2 = jax.random.normal(mix_key, z.shape, jnp.float32)
        ww = mapping_forward(jnp.concatenate([z, z2], axis=0),
                             params["mapping_w"], params["mapping_b"])
        w, w2 = ww[:B], ww[B:]
        crossover_point = py_rng.randint(1, layer_num)
    else:
        w = mapping_forward(z, params["mapping_w"], params["mapping_b"])
        w2, crossover_point = None, None

    prev = cur = None
    for stage in range(1, layer_num + 1):
        w_use = w2 if (crossover_point and stage >= crossover_point) else w
        nxt = g_conv_block(params[block_names[stage - 1]], w_use, cur,
                           first=(stage == 1))
        prev, cur = cur, nxt

    rgbp = params[rgb_names[layer_num - 1]]
    if layer_num == 1:
        return to_rgb_tanh(cur, rgbp)

    N, H, W, _ = cur.shape
    # Skip path: to_rgb(prev) -> bilinear 2x (align_corners=False) -> blend.
    skip_lo = to_rgb_raw(prev, params[rgb_names[layer_num - 2]])  # (N,H/2,W/2,128)
    skip = jax.image.resize(skip_lo, (N, H, W, RGB_PAD), method="bilinear")
    return to_rgb_blend_tanh(cur, rgbp, skip, alpha)


# ----------------------------------------------------------------------------

if __name__ == "__main__":
    key = jax.random.PRNGKey(0)
    k_params, k_z, k_mix = jax.random.split(key, 3)

    params = init_params(k_params, in_c=256)
    z = jax.random.normal(k_z, (2, 256), jnp.float32)   # batch=2, latent=256
    py_rng = random.Random(0)                           # deterministic mixing

    layer_num = 3          # -> 16x16 output (keeps shapes small)
    alpha = 0.5

    out = generator_forward(params, z, layer_num, alpha, k_mix, py_rng)
    out = jax.block_until_ready(out)
    assert out.shape == (2, 16, 16, 3), out.shape
    assert bool(jnp.all(jnp.isfinite(out)))
    print("KERNEL_OK")
</pallas_src>

<mosaic_0001>
module attributes {stable_mosaic.version = 11 : i64} {
  func.func @_mapping_kernel(%arg0: memref<4x256xf32, #tpu.memory_space<vmem>>, %arg1: memref<8x256x256xbf16, #tpu.memory_space<vmem>>, %arg2: memref<8x1x256xf32, #tpu.memory_space<vmem>>, %arg3: memref<4x256xf32, #tpu.memory_space<vmem>>) attributes {dimension_semantics = [], scalar_prefetch = 0 : i64, scratch_operands = 0 : i64, tpu.core_type = #tpu.core_type<tc>} {
    %c0 = arith.constant 0 : index
    %c0_0 = arith.constant 0 : index
    %0 = vector.load %arg0[%c0, %c0_0] : memref<4x256xf32, #tpu.memory_space<vmem>>, vector<4x256xf32>
    %1 = arith.mulf %0, %0 : vector<4x256xf32>
    %cst = arith.constant dense<0.000000e+00> : vector<4xf32>
    %2 = vector.multi_reduction <add>, %1, %cst [1] : vector<4x256xf32> to vector<4xf32>
    %3 = vector.shape_cast %2 : vector<4xf32> to vector<4x1xf32>
    %cst_1 = arith.constant 2.560000e+02 : f32
    %4 = vector.broadcast %cst_1 : f32 to vector<4x1xf32>
    %5 = arith.divf %3, %4 : vector<4x1xf32>
    %cst_2 = arith.constant 9.99999993E-9 : f32
    %6 = vector.broadcast %cst_2 : f32 to vector<4x1xf32>
    %7 = arith.addf %5, %6 : vector<4x1xf32>
    %8 = math.rsqrt %7 : vector<4x1xf32>
    %9 = vector.broadcast %8 : vector<4x1xf32> to vector<4x256xf32>
    %10 = arith.mulf %0, %9 : vector<4x256xf32>
    %11 = arith.truncf %10 : vector<4x256xf32> to vector<4x256xbf16>
    %c0_3 = arith.constant 0 : index
    %c0_4 = arith.constant 0 : index
    %c0_5 = arith.constant 0 : index
    %12 = vector.load %arg1[%c0_3, %c0_4, %c0_5] : memref<8x256x256xbf16, #tpu.memory_space<vmem>>, vector<1x256x256xbf16>
    %13 = vector.shape_cast %12 : vector<1x256x256xbf16> to vector<256x256xbf16>
    %cst_6 = arith.constant dense<0.000000e+00> : vector<4x256xf32>
    %14 = tpu.matmul %11, %13, %cst_6 {dimension_numbers = #tpu.dot_dimension_numbers<[1], [0], [0], [1], [0, 0, 1, 1], [], []>} : vector<4x256xbf16>, vector<256x256xbf16>, vector<4x256xf32> -> vector<4x256xf32>
    %c0_7 = arith.constant 0 : index
    %c0_8 = arith.constant 0 : index
    %c0_9 = arith.constant 0 : index
    %15 = vector.load %arg2[%c0_7, %c0_8, %c0_9] : memref<8x1x256xf32, #tpu.memory_space<vmem>>, vector<1x1x256xf32>
    %16 = vector.shape_cast %15 : vector<1x1x256xf32> to vector<1x256xf32>
    %17 = vector.broadcast %16 : vector<1x256xf32> to vector<4x256xf32>
    %18 = arith.addf %14, %17 : vector<4x256xf32>
    %cst_10 = arith.constant 0.000000e+00 : f32
    %19 = vector.broadcast %cst_10 : f32 to vector<4x256xf32>
    %20 = arith.cmpf oge, %18, %19 : vector<4x256xf32>
    %cst_11 = arith.constant 2.000000e-01 : f32
    %21 = vector.broadcast %cst_11 : f32 to vector<4x256xf32>
    %22 = arith.mulf %21, %18 : vector<4x256xf32>
    %23 = arith.select %20, %18, %22 : vector<4x256xi1>, vector<4x256xf32>
    %24 = arith.truncf %23 : vector<4x256xf32> to vector<4x256xbf16>
    %c1 = arith.constant 1 : index
    %c0_12 = arith.constant 0 : index
    %c0_13 = arith.constant 0 : index
    %25 = vector.load %arg1[%c1, %c0_12, %c0_13] : memref<8x256x256xbf16, #tpu.memory_space<vmem>>, vector<1x256x256xbf16>
    %26 = vector.shape_cast %25 : vector<1x256x256xbf16> to vector<256x256xbf16>
    %cst_14 = arith.constant dense<0.000000e+00> : vector<4x256xf32>
    %27 = tpu.matmul %24, %26, %cst_14 {dimension_numbers = #tpu.dot_dimension_numbers<[1], [0], [0], [1], [0, 0, 1, 1], [], []>} : vector<4x256xbf16>, vector<256x256xbf16>, vector<4x256xf32> -> vector<4x256xf32>
    %c1_15 = arith.constant 1 : index
    %c0_16 = arith.constant 0 : index
    %c0_17 = arith.constant 0 : index
    %28 = vector.load %arg2[%c1_15, %c0_16, %c0_17] : memref<8x1x256xf32, #tpu.memory_space<vmem>>, vector<1x1x256xf32>
    %29 = vector.shape_cast %28 : vector<1x1x256xf32> to vector<1x256xf32>
    %30 = vector.broadcast %29 : vector<1x256xf32> to vector<4x256xf32>
    %31 = arith.addf %27, %30 : vector<4x256xf32>
    %cst_18 = arith.constant 0.000000e+00 : f32
    %32 = vector.broadcast %cst_18 : f32 to vector<4x256xf32>
    %33 = arith.cmpf oge, %31, %32 : vector<4x256xf32>
    %cst_19 = arith.constant 2.000000e-01 : f32
    %34 = vector.broadcast %cst_19 : f32 to vector<4x256xf32>
    %35 = arith.mulf %34, %31 : vector<4x256xf32>
    %36 = arith.select %33, %31, %35 : vector<4x256xi1>, vector<4x256xf32>
    %37 = arith.truncf %36 : vector<4x256xf32> to vector<4x256xbf16>
    %c2 = arith.constant 2 : index
    %c0_20 = arith.constant 0 : index
    %c0_21 = arith.constant 0 : index
    %38 = vector.load %arg1[%c2, %c0_20, %c0_21] : memref<8x256x256xbf16, #tpu.memory_space<vmem>>, vector<1x256x256xbf16>
    %39 = vector.shape_cast %38 : vector<1x256x256xbf16> to vector<256x256xbf16>
    %cst_22 = arith.constant dense<0.000000e+00> : vector<4x256xf32>
    %40 = tpu.matmul %37, %39, %cst_22 {dimension_numbers = #tpu.dot_dimension_numbers<[1], [0], [0], [1], [0, 0, 1, 1], [], []>} : vector<4x256xbf16>, vector<256x256xbf16>, vector<4x256xf32> -> vector<4x256xf32>
    %c2_23 = arith.constant 2 : index
    %c0_24 = arith.constant 0 : index
    %c0_25 = arith.constant 0 : index
    %41 = vector.load %arg2[%c2_23, %c0_24, %c0_25] : memref<8x1x256xf32, #tpu.memory_space<vmem>>, vector<1x1x256xf32>
    %42 = vector.shape_cast %41 : vector<1x1x256xf32> to vector<1x256xf32>
    %43 = vector.broadcast %42 : vector<1x256xf32> to vector<4x256xf32>
    %44 = arith.addf %40, %43 : vector<4x256xf32>
    %cst_26 = arith.constant 0.000000e+00 : f32
    %45 = vector.broadcast %cst_26 : f32 to vector<4x256xf32>
    %46 = arith.cmpf oge, %44, %45 : vector<4x256xf32>
    %cst_27 = arith.constant 2.000000e-01 : f32
    %47 = vector.broadcast %cst_27 : f32 to vector<4x256xf32>
    %48 = arith.mulf %47, %44 : vector<4x256xf32>
    %49 = arith.select %46, %44, %48 : vector<4x256xi1>, vector<4x256xf32>
    %50 = arith.truncf %49 : vector<4x256xf32> to vector<4x256xbf16>
    %c3 = arith.constant 3 : index
    %c0_28 = arith.constant 0 : index
    %c0_29 = arith.constant 0 : index
    %51 = vector.load %arg1[%c3, %c0_28, %c0_29] : memref<8x256x256xbf16, #tpu.memory_space<vmem>>, vector<1x256x256xbf16>
    %52 = vector.shape_cast %51 : vector<1x256x256xbf16> to vector<256x256xbf16>
    %cst_30 = arith.constant dense<0.000000e+00> : vector<4x256xf32>
    %53 = tpu.matmul %50, %52, %cst_30 {dimension_numbers = #tpu.dot_dimension_numbers<[1], [0], [0], [1], [0, 0, 1, 1], [], []>} : vector<4x256xbf16>, vector<256x256xbf16>, vector<4x256xf32> -> vector<4x256xf32>
    %c3_31 = arith.constant 3 : index
    %c0_32 = arith.constant 0 : index
    %c0_33 = arith.constant 0 : index
    %54 = vector.load %arg2[%c3_31, %c0_32, %c0_33] : memref<8x1x256xf32, #tpu.memory_space<vmem>>, vector<1x1x256xf32>
    %55 = vector.shape_cast %54 : vector<1x1x256xf32> to vector<1x256xf32>
    %56 = vector.broadcast %55 : vector<1x256xf32> to vector<4x256xf32>
    %57 = arith.addf %53, %56 : vector<4x256xf32>
    %cst_34 = arith.constant 0.000000e+00 : f32
    %58 = vector.broadcast %cst_34 : f32 to vector<4x256xf32>
    %59 = arith.cmpf oge, %57, %58 : vector<4x256xf32>
    %cst_35 = arith.constant 2.000000e-01 : f32
    %60 = vector.broadcast %cst_35 : f32 to vector<4x256xf32>
    %61 = arith.mulf %60, %57 : vector<4x256xf32>
    %62 = arith.select %59, %57, %61 : vector<4x256xi1>, vector<4x256xf32>
    %63 = arith.truncf %62 : vector<4x256xf32> to vector<4x256xbf16>
    %c4 = arith.constant 4 : index
    %c0_36 = arith.constant 0 : index
    %c0_37 = arith.constant 0 : index
    %64 = vector.load %arg1[%c4, %c0_36, %c0_37] : memref<8x256x256xbf16, #tpu.memory_space<vmem>>, vector<1x256x256xbf16>
    %65 = vector.shape_cast %64 : vector<1x256x256xbf16> to vector<256x256xbf16>
    %cst_38 = arith.constant dense<0.000000e+00> : vector<4x256xf32>
    %66 = tpu.matmul %63, %65, %cst_38 {dimension_numbers = #tpu.dot_dimension_numbers<[1], [0], [0], [1], [0, 0, 1, 1], [], []>} : vector<4x256xbf16>, vector<256x256xbf16>, vector<4x256xf32> -> vector<4x256xf32>
    %c4_39 = arith.constant 4 : index
    %c0_40 = arith.constant 0 : index
    %c0_41 = arith.constant 0 : index
    %67 = vector.load %arg2[%c4_39, %c0_40, %c0_41] : memref<8x1x256xf32, #tpu.memory_space<vmem>>, vector<1x1x256xf32>
    %68 = vector.shape_cast %67 : vector<1x1x256xf32> to vector<1x256xf32>
    %69 = vector.broadcast %68 : vector<1x256xf32> to vector<4x256xf32>
    %70 = arith.addf %66, %69 : vector<4x256xf32>
    %cst_42 = arith.constant 0.000000e+00 : f32
    %71 = vector.broadcast %cst_42 : f32 to vector<4x256xf32>
    %72 = arith.cmpf oge, %70, %71 : vector<4x256xf32>
    %cst_43 = arith.constant 2.000000e-01 : f32
    %73 = vector.broadcast %cst_43 : f32 to vector<4x256xf32>
    %74 = arith.mulf %73, %70 : vector<4x256xf32>
    %75 = arith.select %72, %70, %74 : vector<4x256xi1>, vector<4x256xf32>
    %76 = arith.truncf %75 : vector<4x256xf32> to vector<4x256xbf16>
    %c5 = arith.constant 5 : index
    %c0_44 = arith.constant 0 : index
    %c0_45 = arith.constant 0 : index
    %77 = vector.load %arg1[%c5, %c0_44, %c0_45] : memref<8x256x256xbf16, #tpu.memory_space<vmem>>, vector<1x256x256xbf16>
    %78 = vector.shape_cast %77 : vector<1x256x256xbf16> to vector<256x256xbf16>
    %cst_46 = arith.constant dense<0.000000e+00> : vector<4x256xf32>
    %79 = tpu.matmul %76, %78, %cst_46 {dimension_numbers = #tpu.dot_dimension_numbers<[1], [0], [0], [1], [0, 0, 1, 1], [], []>} : vector<4x256xbf16>, vector<256x256xbf16>, vector<4x256xf32> -> vector<4x256xf32>
    %c5_47 = arith.constant 5 : index
    %c0_48 = arith.constant 0 : index
    %c0_49 = arith.constant 0 : index
    %80 = vector.load %arg2[%c5_47, %c0_48, %c0_49] : memref<8x1x256xf32, #tpu.memory_space<vmem>>, vector<1x1x256xf32>
    %81 = vector.shape_cast %80 : vector<1x1x256xf32> to vector<1x256xf32>
    %82 = vector.broadcast %81 : vector<1x256xf32> to vector<4x256xf32>
    %83 = arith.addf %79, %82 : vector<4x256xf32>
    %cst_50 = arith.constant 0.000000e+00 : f32
    %84 = vector.broadcast %cst_50 : f32 to vector<4x256xf32>
    %85 = arith.cmpf oge, %83, %84 : vector<4x256xf32>
    %cst_51 = arith.constant 2.000000e-01 : f32
    %86 = vector.broadcast %cst_51 : f32 to vector<4x256xf32>
    %87 = arith.mulf %86, %83 : vector<4x256xf32>
    %88 = arith.select %85, %83, %87 : vector<4x256xi1>, vector<4x256xf32>
    %89 = arith.truncf %88 : vector<4x256xf32> to vector<4x256xbf16>
    %c6 = arith.constant 6 : index
    %c0_52 = arith.constant 0 : index
    %c0_53 = arith.constant 0 : index
    %90 = vector.load %arg1[%c6, %c0_52, %c0_53] : memref<8x256x256xbf16, #tpu.memory_space<vmem>>, vector<1x256x256xbf16>
    %91 = vector.shape_cast %90 : vector<1x256x256xbf16> to vector<256x256xbf16>
    %cst_54 = arith.constant dense<0.000000e+00> : vector<4x256xf32>
    %92 = tpu.matmul %89, %91, %cst_54 {dimension_numbers = #tpu.dot_dimension_numbers<[1], [0], [0], [1], [0, 0, 1, 1], [], []>} : vector<4x256xbf16>, vector<256x256xbf16>, vector<4x256xf32> -> vector<4x256xf32>
    %c6_55 = arith.constant 6 : index
    %c0_56 = arith.constant 0 : index
    %c0_57 = arith.constant 0 : index
    %93 = vector.load %arg2[%c6_55, %c0_56, %c0_57] : memref<8x1x256xf32, #tpu.memory_space<vmem>>, vector<1x1x256xf32>
    %94 = vector.shape_cast %93 : vector<1x1x256xf32> to vector<1x256xf32>
    %95 = vector.broadcast %94 : vector<1x256xf32> to vector<4x256xf32>
    %96 = arith.addf %92, %95 : vector<4x256xf32>
    %cst_58 = arith.constant 0.000000e+00 : f32
    %97 = vector.broadcast %cst_58 : f32 to vector<4x256xf32>
    %98 = arith.cmpf oge, %96, %97 : vector<4x256xf32>
    %cst_59 = arith.constant 2.000000e-01 : f32
    %99 = vector.broadcast %cst_59 : f32 to vector<4x256xf32>
    %100 = arith.mulf %99, %96 : vector<4x256xf32>
    %101 = arith.select %98, %96, %100 : vector<4x256xi1>, vector<4x256xf32>
    %102 = arith.truncf %101 : vector<4x256xf32> to vector<4x256xbf16>
    %c7 = arith.constant 7 : index
    %c0_60 = arith.constant 0 : index
    %c0_61 = arith.constant 0 : index
    %103 = vector.load %arg1[%c7, %c0_60, %c0_61] : memref<8x256x256xbf16, #tpu.memory_space<vmem>>, vector<1x256x256xbf16>
    %104 = vector.shape_cast %103 : vector<1x256x256xbf16> to vector<256x256xbf16>
    %cst_62 = arith.constant dense<0.000000e+00> : vector<4x256xf32>
    %105 = tpu.matmul %102, %104, %cst_62 {dimension_numbers = #tpu.dot_dimension_numbers<[1], [0], [0], [1], [0, 0, 1, 1], [], []>} : vector<4x256xbf16>, vector<256x256xbf16>, vector<4x256xf32> -> vector<4x256xf32>
    %c7_63 = arith.constant 7 : index
    %c0_64 = arith.constant 0 : index
    %c0_65 = arith.constant 0 : index
    %106 = vector.load %arg2[%c7_63, %c0_64, %c0_65] : memref<8x1x256xf32, #tpu.memory_space<vmem>>, vector<1x1x256xf32>
    %107 = vector.shape_cast %106 : vector<1x1x256xf32> to vector<1x256xf32>
    %108 = vector.broadcast %107 : vector<1x256xf32> to vector<4x256xf32>
    %109 = arith.addf %105, %108 : vector<4x256xf32>
    %cst_66 = arith.constant 0.000000e+00 : f32
    %110 = vector.broadcast %cst_66 : f32 to vector<4x256xf32>
    %111 = arith.cmpf oge, %109, %110 : vector<4x256xf32>
    %cst_67 = arith.constant 2.000000e-01 : f32
    %112 = vector.broadcast %cst_67 : f32 to vector<4x256xf32>
    %113 = arith.mulf %112, %109 : vector<4x256xf32>
    %114 = arith.select %111, %109, %113 : vector<4x256xi1>, vector<4x256xf32>
    %c0_68 = arith.constant 0 : index
    %c0_69 = arith.constant 0 : index
    %115 = vector.load %arg3[%c0_68, %c0_69] : memref<4x256xf32, #tpu.memory_space<vmem>>, vector<4x256xf32>
    tpu.vector_store %arg3[%c0_68, %c0_69], %114 {strides = array<i32>} : memref<4x256xf32, #tpu.memory_space<vmem>>, vector<4x256xf32>,
    return
  }
}

</mosaic_0001>

<bundles_post_ra>
// kernel: tpu_custom_call.1
= control target key start
LH: loop header
LB: loop body
LE: loop exit
PB: predicated region body
PF: predicated region fallthrough
CT: control target
= control target key end

     0   :  { %8 = vsyncpa [#allocation3], 0  ;;  %s2993_s0 = inlined_call_operand.hbm [shape: f32[4,256], index: 0, kind: input, shape index: {}]   ;;  %s2994_s1 = inlined_call_operand.hbm [shape: bf16[8,256,256], index: 1, kind: input, shape index: {}]   ;;  %s2995_s2 = inlined_call_operand.hbm [shape: f32[8,1,256], index: 2, kind: input, shape index: {}]   ;;  %s2996_s3 = inlined_call_operand.hbm [shape: f32[4,256], index: 3, kind: output, shape index: {}]  }
   0x1   :  { %9 = vsyncpa [#allocation6], 0 }
   0x2   :  { %10 = vsyncpa [#allocation4], 0  ;;  %s2886_s12 = smov [#allocation5]   ;;  %s2792_s16 = scalar_lea.hbm %s2994_s1, 32768 }
   0x3   :  { %s26_s13 = sshll.u32 %s2886_s12, 4  ;;  %p2793_p0 = scmp.ne.s32.totalorder %s2994_s1, %s2792_s16  ;;  %s27_s13 = int_to_ptr.vmem [resolvable:$true] %s26_s13 }
   0x4   :  { %p2796_p1 = scmp.lt.u32.totalorder %s2792_s16, %s2994_s1 }
   0x6   :  { %p2798_p2 = pnand %p2796_p1, %p2793_p0 }
   0x8   :  { %2801 = shalt.err (!%p2798_p2)
}
   0x9   :  { %s2802_s21 = scalar_lea.vmem %s27_s13, 32768  ;;  %p2807_p4 = scmp.lt.s32.totalorder %s27_s13, %s27_s13 }
   0xa   :  { %p2803_p3 = scmp.ne.s32.totalorder %s27_s13, %s2802_s21  ;;  %p2808_p5 = scmp.lt.s32.totalorder %s2802_s21, %s2802_s21 }
   0xc   :  { %p2809_p6 = por %p2808_p5, %p2807_p4 }
   0xe   :  { %p2810_p7 = pnand %p2809_p6, %p2803_p3 }
  0x10   :  { %2813 = shalt.err (!%p2810_p7)
}
  0x11   :  { %s2887_s22 = smov 128   ;;  %s2888_s23 = smov 8  }
  0x12   :  { %32 = dma.hbm_to_vmem [thread:$0]  %s2994_s1, 32768, %s27_s13, [#allocation6], %s2887_s22, %s2887_s22, %s2888_s23  }
  0x13   :  { %s2889_s26 = smov [#allocation2]   ;;  %s2890_s28 = smov [#allocation7]  }
  0x14   :  { %s17_s27 = sshll.u32 %s2889_s26, 4  ;;  %s38_s29 = sshll.u32 %s2890_s28, 4  ;;  %s18_s27 = int_to_ptr.vmem [resolvable:$true] %s17_s27  ;;  %s39_s29 = int_to_ptr.vmem [resolvable:$true] %s38_s29 }
  0x15   :  { %s2814_s5 = scalar_lea.hbm %s2993_s0, 128 }
  0x16   :  { %p2815_p8 = scmp.ne.s32.totalorder %s2993_s0, %s2814_s5  ;;  %p2818_p9 = scmp.lt.u32.totalorder %s2814_s5, %s2993_s0 }
  0x18   :  { %p2820_p10 = pnand %p2818_p9, %p2815_p8 }
  0x1a   :  { %2823 = shalt.err (!%p2820_p10)
}
  0x1b   :  { %s2824_s1 = scalar_lea.vmem %s18_s27, 128  ;;  %p2829_p12 = scmp.lt.s32.totalorder %s18_s27, %s18_s27 }
  0x1c   :  { %p2825_p11 = scmp.ne.s32.totalorder %s18_s27, %s2824_s1  ;;  %p2830_p13 = scmp.lt.s32.totalorder %s2824_s1, %s2824_s1 }
  0x1e   :  { %p2831_p0 = por %p2830_p13, %p2829_p12 }
  0x20   :  { %p2832_p1 = pnand %p2831_p0, %p2825_p11 }
  0x22   :  { %2835 = shalt.err (!%p2832_p1)
}
  0x23   :  { %20 = dma.hbm_to_vmem [thread:$0]  %s2993_s0, 128, %s18_s27, [#allocation3]  }
  0x24   :  { %s2836_s14 = scalar_lea.hbm %s2995_s2, 256 }
  0x25   :  { %p2837_p2 = scmp.ne.s32.totalorder %s2995_s2, %s2836_s14  ;;  %p2840_p3 = scmp.lt.u32.totalorder %s2836_s14, %s2995_s2 }
  0x27   :  { %p2842_p4 = pnand %p2840_p3, %p2837_p2 }
  0x29   :  { %2845 = shalt.err (!%p2842_p4)
}
  0x2a   :  { %s2846_s19 = scalar_lea.vmem %s39_s29, 256  ;;  %p2851_p6 = scmp.lt.s32.totalorder %s39_s29, %s39_s29 }
  0x2b   :  { %p2847_p5 = scmp.ne.s32.totalorder %s39_s29, %s2846_s19  ;;  %p2852_p7 = scmp.lt.s32.totalorder %s2846_s19, %s2846_s19 }
  0x2d   :  { %p2853_p8 = por %p2852_p7, %p2851_p6 }
  0x2f   :  { %p2854_p9 = pnand %p2853_p8, %p2847_p5 }
  0x31   :  { %2857 = shalt.err (!%p2854_p9)
}
  0x32   :  { %s2891_s0 = smov 32   ;;  %s2892_s20 = smov 2  }
  0x33   :  { %44 = dma.hbm_to_vmem [thread:$0]  %s2995_s2, 256, %s39_s29, [#allocation6], %s2891_s0, %s2891_s0, %s2892_s20  }
  0x34   :  { %2880 = dma.done.wait [#allocation3], 128  }
  0x35   :  { %2881 = vsyncadd [#allocation3], 4294967168 }
  0x36   :  { %2882 = dma.done.wait [#allocation6], 33024  }
  0x37   :  { %2883 = vsyncadd [#allocation6], 4294934272  ;;  %v2951_v0 = vld [vmem:[#allocation2] sm:$0xff]  ;;  %vm59_vm0 = vcmask 1043456   ;;  %v2406_v2 = vld [vmem:[#allocation5 + $0x4] ss:$8 sps:$4 sm:$0xff]  }
  0x38   :  { %v55_v1 = vmul.f32 %v2951_v0, %v2951_v0  ;;  %v2408_v3 = vld [vmem:[#allocation5] ss:$8 sps:$4 sm:$0xff]   ;;  %v2409_v4 = vld [vmem:[#allocation5 + $0x14] ss:$8 sps:$4 sm:$0xff]   ;;  %288 = vmatprep.subr.bf16.mxu0 %v2406_v2  ;;  %v2411_v7 = vld [vmem:[#allocation5 + $0x10] ss:$8 sps:$4 sm:$0xff]  }
  0x39   :  { %289 = vmatpush1.bf16.msra.mxu0 %v2408_v3  ;;  %v2412_v9 = vld [vmem:[#allocation5 + $0x24] ss:$8 sps:$4 sm:$0xff]   ;;  %v2414_v11 = vld [vmem:[#allocation5 + $0x20] ss:$8 sps:$4 sm:$0xff]   ;;  %v2415_v12 = vld [vmem:[#allocation5 + $0x34] ss:$8 sps:$4 sm:$0xff]  }
  0x3a   :  { %v57_v5 = vcombine.high %v55_v1, %v55_v1  ;;  %v60_v6 = vsel %vm59_vm0, %v55_v1, 0.0  ;;  %290 = vmatprep.subr.bf16.mxu0 %v2409_v4  ;;  %v2417_v13 = vld [vmem:[#allocation5 + $0x30] ss:$8 sps:$4 sm:$0xff]   ;;  %v2418_v14 = vld [vmem:[#allocation5 + $0x44] ss:$8 sps:$4 sm:$0xff]   ;;  %s2894_s2 = smov [#allocation8]  }
  0x3b   :  { %v2420_v15 = vld [vmem:[#allocation5 + $0x40] ss:$8 sps:$4 sm:$0xff]   ;;  %v2421_v16 = vld [vmem:[#allocation5 + $0x54] ss:$8 sps:$4 sm:$0xff]   ;;  %v2423_v17 = vld [vmem:[#allocation5 + $0x50] ss:$8 sps:$4 sm:$0xff]  }
  0x3c   :  { %v61_v8 = vsel %vm59_vm0, %v57_v5, 0.0  ;;  %v2424_v18 = vld [vmem:[#allocation5 + $0x64] ss:$8 sps:$4 sm:$0xff]   ;;  %v2426_v19 = vld [vmem:[#allocation5 + $0x60] ss:$8 sps:$4 sm:$0xff]   ;;  %s2131_s23 = sshll.u32 %s2894_s2, 4  ;;  %s2132_s23 = int_to_ptr.vmem [resolvable:$true] %s2131_s23 }
  0x3d   :  { %v62_v10 = vadd.f32 %v61_v8, %v60_v6  ;;  %291 = vmatpush1.bf16.msra.mxu0 %v2411_v7  ;;  %v2427_v20 = vld [vmem:[#allocation5 + $0x74] ss:$8 sps:$4 sm:$0xff]   ;;  %v2429_v21 = vld [vmem:[#allocation5 + $0x70] ss:$8 sps:$4 sm:$0xff]   ;;  %v2430_v22 = vld [vmem:[#allocation5 + $0x84] ss:$8 sps:$4 sm:$0xff]   ;;  %v73_v8 = vlaneseq  ;;  %p2863_p11 = scmp.lt.s32.totalorder %s2132_s23, %s2132_s23 }
  0x3e   :  { %292 = vmatprep.subr.bf16.mxu0 %v2412_v9  ;;  %v2432_v23 = vld [vmem:[#allocation5 + $0x80] ss:$8 sps:$4 sm:$0xff]   ;;  %v2433_v24 = vld [vmem:[#allocation5 + $0x94] ss:$8 sps:$4 sm:$0xff]   ;;  %v2435_v25 = vld [vmem:[#allocation5 + $0x90] ss:$8 sps:$4 sm:$0xff]  }
  0x3f   :  { %63 = vadd.xlane.f32.xlu0 %v62_v10  ;;  %v2436_v26 = vld [vmem:[#allocation5 + $0xa4] ss:$8 sps:$4 sm:$0xff]   ;;  %v2438_v27 = vld [vmem:[#allocation5 + $0xa0] ss:$8 sps:$4 sm:$0xff]   ;;  %v2439_v28 = vld [vmem:[#allocation5 + $0xb4] ss:$8 sps:$4 sm:$0xff]  }
  0x40   :  { %v2441_v29 = vld [vmem:[#allocation5 + $0xb0] ss:$8 sps:$4 sm:$0xff]   ;;  %v2442_v30 = vld [vmem:[#allocation5 + $0xc4] ss:$8 sps:$4 sm:$0xff]   ;;  %v2456_v32 = vld [vmem:[#allocation5 + $0x100] ss:$8 sps:$4 sm:$0xff]  }
  0x41   :  { %293 = vmatpush1.bf16.msra.mxu0 %v2414_v11  ;;  %v2454_v31 = vld [vmem:[#allocation5 + $0x104] ss:$8 sps:$4 sm:$0xff]   ;;  %v2457_v33 = vld [vmem:[#allocation5 + $0x114] ss:$8 sps:$4 sm:$0xff]   ;;  %v2444_v34 = vld [vmem:[#allocation5 + $0xc0] ss:$8 sps:$4 sm:$0xff]  }
  0x42   :  { %294 = vmatprep.subr.bf16.mxu0 %v2415_v12  ;;  %543 = vmatprep.subr.bf16.mxu1 %v2454_v31  ;;  %v2445_v35 = vld [vmem:[#allocation5 + $0xd4] ss:$8 sps:$4 sm:$0xff]   ;;  %v2459_v36 = vld [vmem:[#allocation5 + $0x110] ss:$8 sps:$4 sm:$0xff]   ;;  %v2460_v37 = vld [vmem:[#allocation5 + $0x124] ss:$8 sps:$4 sm:$0xff]  }
  0x43   :  { %544 = vmatpush1.bf16.msra.mxu1 %v2456_v32  ;;  %v2447_v38 = vld [vmem:[#allocation5 + $0xd0] ss:$8 sps:$4 sm:$0xff]   ;;  %v2448_v39 = vld [vmem:[#allocation5 + $0xe4] ss:$8 sps:$4 sm:$0xff]   ;;  %v2462_v40 = vld [vmem:[#allocation5 + $0x120] ss:$8 sps:$4 sm:$0xff]  }
  0x44   :  { %545 = vmatprep.subr.bf16.mxu1 %v2457_v33  ;;  %v2450_v41 = vld [vmem:[#allocation5 + $0xe0] ss:$8 sps:$4 sm:$0xff]   ;;  %v2463_v42 = vld [vmem:[#allocation5 + $0x134] ss:$8 sps:$4 sm:$0xff]   ;;  %v2465_v44 = vld [vmem:[#allocation5 + $0x130] ss:$8 sps:$4 sm:$0xff]  }
  0x45   :  { %295 = vmatpush1.bf16.msra.mxu0 %v2417_v13  ;;  %v2451_v43 = vld [vmem:[#allocation5 + $0xf4] ss:$8 sps:$4 sm:$0xff]   ;;  %v2466_v45 = vld [vmem:[#allocation5 + $0x144] ss:$8 sps:$4 sm:$0xff]   ;;  %v2453_v46 = vld [vmem:[#allocation5 + $0xf0] ss:$8 sps:$4 sm:$0xff]  }
  0x46   :  { %296 = vmatprep.subr.bf16.mxu0 %v2418_v14  ;;  %v2468_v47 = vld [vmem:[#allocation5 + $0x140] ss:$8 sps:$4 sm:$0xff]   ;;  %v2469_v48 = vld [vmem:[#allocation5 + $0x154] ss:$8 sps:$4 sm:$0xff]   ;;  %v2471_v49 = vld [vmem:[#allocation5 + $0x150] ss:$8 sps:$4 sm:$0xff]  }
  0x47   :  { %546 = vmatpush1.bf16.msra.mxu1 %v2459_v36  ;;  %v2472_v50 = vld [vmem:[#allocation5 + $0x164] ss:$8 sps:$4 sm:$0xff]   ;;  %v2474_v51 = vld [vmem:[#allocation5 + $0x160] ss:$8 sps:$4 sm:$0xff]   ;;  %v2475_v52 = vld [vmem:[#allocation5 + $0x174] ss:$8 sps:$4 sm:$0xff]  }
  0x48   :  { %547 = vmatprep.subr.bf16.mxu1 %v2460_v37  ;;  %v2477_v53 = vld [vmem:[#allocation5 + $0x170] ss:$8 sps:$4 sm:$0xff]   ;;  %v2478_v54 = vld [vmem:[#allocation5 + $0x184] ss:$8 sps:$4 sm:$0xff]   ;;  %v2480_v55 = vld [vmem:[#allocation5 + $0x180] ss:$8 sps:$4 sm:$0xff]  }
  0x49   :  { %297 = vmatpush1.bf16.msra.mxu0 %v2420_v15  ;;  %v2481_v56 = vld [vmem:[#allocation5 + $0x194] ss:$8 sps:$4 sm:$0xff]   ;;  %v2483_v57 = vld [vmem:[#allocation5 + $0x190] ss:$8 sps:$4 sm:$0xff]   ;;  %v2484_v58 = vld [vmem:[#allocation5 + $0x1a4] ss:$8 sps:$4 sm:$0xff]  }
  0x4a   :  { %298 = vmatprep.subr.bf16.mxu0 %v2421_v16  ;;  %v2486_v59 = vld [vmem:[#allocation5 + $0x1a0] ss:$8 sps:$4 sm:$0xff]   ;;  %v2487_v60 = vld [vmem:[#allocation5 + $0x1b4] ss:$8 sps:$4 sm:$0xff]   ;;  %v2489_v61 = vld [vmem:[#allocation5 + $0x1b0] ss:$8 sps:$4 sm:$0xff]  }
  0x4b   :  { %548 = vmatpush1.bf16.msra.mxu1 %v2462_v40  ;;  %v2490_v62 = vld [vmem:[#allocation5 + $0x1c4] ss:$8 sps:$4 sm:$0xff]   ;;  %v2492_v63 = vld [vmem:[#allocation5 + $0x1c0] ss:$8 sps:$4 sm:$0xff]   ;;  %v2493_v1 = vld [vmem:[#allocation5 + $0x1d4] ss:$8 sps:$4 sm:$0xff]  }
  0x4c   :  { %549 = vmatprep.subr.bf16.mxu1 %v2463_v42  ;;  %v2495_v2 = vld [vmem:[#allocation5 + $0x1d0] ss:$8 sps:$4 sm:$0xff]   ;;  %v2893_v6 = vmov 839922192   ;;  %v2955_v10 = vshrl.u32 %v73_v8, 7  ;;  %s2858_s24 = scalar_lea.vmem %s2132_s23, 128 }
  0x4d   :  { %299 = vmatpush1.bf16.msra.mxu0 %v2423_v17  ;;  %v71_v7 = vunpack.c.l.s4 %v2893_v6  ;;  %v2519_v31 = vld [vmem:[#allocation5 + $0x254] ss:$8 sps:$4 sm:$0xff]   ;;  %v2517_v32 = vld [vmem:[#allocation5 + $0x250] ss:$8 sps:$4 sm:$0xff]   ;;  %v2522_v33 = vld [vmem:[#allocation5 + $0x264] ss:$8 sps:$4 sm:$0xff]   ;;  %p2859_p10 = scmp.ne.s32.totalorder %s2132_s23, %s2858_s24  ;;  %p2864_p12 = scmp.lt.s32.totalorder %s2858_s24, %s2858_s24 }
  0x4e   :  { %300 = vmatprep.subr.bf16.mxu0 %v2424_v18  ;;  %v2496_v18 = vld [vmem:[#allocation5 + $0x1e4] ss:$8 sps:$4 sm:$0xff]   ;;  %v2523_v36 = vld [vmem:[#allocation5 + $0x270] ss:$8 sps:$4 sm:$0xff]   ;;  %v2532_v42 = vld [vmem:[#allocation5 + $0x2a0] ss:$8 sps:$4 sm:$0xff]  }
  0x4f   :  { %550 = vmatpush1.bf16.msra.mxu1 %v2465_v44  ;;  %v72_v9 = vunpack.c.0.s8 %v71_v7  ;;  %v2528_v37 = vld [vmem:[#allocation5 + $0x284] ss:$8 sps:$4 sm:$0xff]   ;;  %v2529_v40 = vld [vmem:[#allocation5 + $0x290] ss:$8 sps:$4 sm:$0xff]   ;;  %v2550_v7 = vld [vmem:[#allocation5 + $0x300] ss:$8 sps:$4 sm:$0xff]   ;;  %p2865_p13 = por %p2864_p12, %p2863_p11 }
  0x50   :  { %551 = vmatprep.subr.bf16.mxu1 %v2466_v45  ;;  %v2535_v44 = vld [vmem:[#allocation5 + $0x2b0] ss:$8 sps:$4 sm:$0xff]   ;;  %v2540_v45 = vld [vmem:[#allocation5 + $0x2c4] ss:$8 sps:$4 sm:$0xff]  }
  0x51   :  { %301 = vmatpush1.bf16.msra.mxu0 %v2426_v19  ;;  %v75_v11 = vsub.s32 %v72_v9, %v2955_v10  ;;  %v2498_v19 = vld [vmem:[#allocation5 + $0x1e0] ss:$8 sps:$4 sm:$0xff]   ;;  %v2547_v6 = vld [vmem:[#allocation5 + $0x2f0] ss:$8 sps:$4 sm:$0xff]   ;;  %v2552_v8 = vld [vmem:[#allocation5 + $0x304] ss:$8 sps:$4 sm:$0xff]   ;;  %p2866_p0 = pnand %p2865_p13, %p2859_p10 }
  0x52   :  { %302 = vmatprep.subr.bf16.mxu0 %v2427_v20  ;;  %v2499_v20 = vld [vmem:[#allocation5 + $0x1f4] ss:$8 sps:$4 sm:$0xff]  }
  0x53   :  { %552 = vmatpush1.bf16.msra.mxu1 %v2468_v47  ;;  %v2543_v47 = vld [vmem:[#allocation5 + $0x2d4] ss:$8 sps:$4 sm:$0xff]  }
  0x54   :  { %553 = vmatprep.subr.bf16.mxu1 %v2469_v48  ;;  %v2541_v48 = vld [vmem:[#allocation5 + $0x2d0] ss:$8 sps:$4 sm:$0xff]   ;;  %v2555_v9 = vld [vmem:[#allocation5 + $0x314] ss:$8 sps:$4 sm:$0xff]  }
  0x55   :  { %303 = vmatpush1.bf16.msra.mxu0 %v2429_v21  ;;  %v2501_v21 = vld [vmem:[#allocation5 + $0x1f0] ss:$8 sps:$4 sm:$0xff]  }
  0x56   :  { %304 = vmatprep.subr.bf16.mxu0 %v2430_v22  ;;  %v2502_v22 = vld [vmem:[#allocation5 + $0x200] ss:$8 sps:$4 sm:$0xff]  }
  0x57   :  { %554 = vmatpush1.bf16.msra.mxu1 %v2471_v49  ;;  %v2960_v49 = vsub.s32 0, %v2955_v10 }
  0x58   :  { %555 = vmatprep.subr.bf16.mxu1 %v2472_v50  ;;  %v2963_v50 = vsub.s32 1, %v2955_v10  ;;  %v2553_v10 = vld [vmem:[#allocation5 + $0x310] ss:$8 sps:$4 sm:$0xff]  }
  0x59   :  { %305 = vmatpush1.bf16.msra.mxu0 %v2432_v23  ;;  %v2504_v23 = vld [vmem:[#allocation5 + $0x204] ss:$8 sps:$4 sm:$0xff]  }
  0x5a   :  { %306 = vmatprep.subr.bf16.mxu0 %v2433_v24  ;;  %v2507_v24 = vld [vmem:[#allocation5 + $0x214] ss:$8 sps:$4 sm:$0xff]  }
  0x5b   :  { %556 = vmatpush1.bf16.msra.mxu1 %v2474_v51  ;;  %v116_v51 = vld [vmem:[#allocation7] sm:$0x3] }
  0x5c   :  { %557 = vmatprep.subr.bf16.mxu1 %v2475_v52  ;;  %v121_v52 = vrot.slane %v116_v51, %v2960_v49 }
  0x5d   :  { %307 = vmatpush1.bf16.msra.mxu0 %v2435_v25  ;;  %v2505_v25 = vld [vmem:[#allocation5 + $0x210] ss:$8 sps:$4 sm:$0xff]  }
  0x5e   :  { %308 = vmatprep.subr.bf16.mxu0 %v2436_v26  ;;  %v2508_v26 = vld [vmem:[#allocation5 + $0x220] ss:$8 sps:$4 sm:$0xff]  }
  0x5f   :  { %558 = vmatpush1.bf16.msra.mxu1 %v2477_v53  ;;  %v125_v53 = vrot.slane %v116_v51, %v2963_v50  ;;  %v2594_v51 = vld [vmem:[#allocation5 + $0x3e4] ss:$8 sps:$4 sm:$0xff]  }
  0x60   :  { %559 = vmatprep.subr.bf16.mxu1 %v2478_v54 }
  0x61   :  { %309 = vmatpush1.bf16.msra.mxu0 %v2438_v27  ;;  %v2513_v27 = vld [vmem:[#allocation5 + $0x234] ss:$8 sps:$4 sm:$0xff]  }
  0x62   :  { %310 = vmatprep.subr.bf16.mxu0 %v2439_v28  ;;  %v2511_v28 = vld [vmem:[#allocation5 + $0x230] ss:$8 sps:$4 sm:$0xff]  }
  0x63   :  { %560 = vmatpush1.bf16.msra.mxu1 %v2480_v55 }
  0x64   :  { %561 = vmatprep.subr.bf16.mxu1 %v2481_v56 }
  0x65   :  { %311 = vmatpush1.bf16.msra.mxu0 %v2441_v29  ;;  %v2516_v29 = vld [vmem:[#allocation5 + $0x244] ss:$8 sps:$4 sm:$0xff]  }
  0x66   :  { %312 = vmatprep.subr.bf16.mxu0 %v2442_v30  ;;  %v2514_v30 = vld [vmem:[#allocation5 + $0x240] ss:$8 sps:$4 sm:$0xff]  }
  0x67   :  { %562 = vmatpush1.bf16.msra.mxu1 %v2483_v57 }
  0x68   :  { %563 = vmatprep.subr.bf16.mxu1 %v2484_v58 }
  0x69   :  { %313 = vmatpush1.bf16.msra.mxu0 %v2444_v34  ;;  %v2520_v34 = vld [vmem:[#allocation5 + $0x260] ss:$8 sps:$4 sm:$0xff]  }
  0x6a   :  { %314 = vmatprep.subr.bf16.mxu0 %v2445_v35  ;;  %v2525_v35 = vld [vmem:[#allocation5 + $0x274] ss:$8 sps:$4 sm:$0xff]  }
  0x6b   :  { %564 = vmatpush1.bf16.msra.mxu1 %v2486_v59 }
  0x6c   :  { %565 = vmatprep.subr.bf16.mxu1 %v2487_v60 }
  0x6d   :  { %315 = vmatpush1.bf16.msra.mxu0 %v2447_v38  ;;  %v2526_v38 = vld [vmem:[#allocation5 + $0x280] ss:$8 sps:$4 sm:$0xff]  }
  0x6e   :  { %316 = vmatprep.subr.bf16.mxu0 %v2448_v39  ;;  %v2531_v39 = vld [vmem:[#allocation5 + $0x294] ss:$8 sps:$4 sm:$0xff]  }
  0x6f   :  { %566 = vmatpush1.bf16.msra.mxu1 %v2489_v61 }
  0x70   :  { %567 = vmatprep.subr.bf16.mxu1 %v2490_v62 }
  0x71   :  { %317 = vmatpush1.bf16.msra.mxu0 %v2450_v41  ;;  %v2534_v41 = vld [vmem:[#allocation5 + $0x2a4] ss:$8 sps:$4 sm:$0xff]  }
  0x72   :  { %318 = vmatprep.subr.bf16.mxu0 %v2451_v43  ;;  %v2537_v43 = vld [vmem:[#allocation5 + $0x2b4] ss:$8 sps:$4 sm:$0xff]  }
  0x73   :  { %568 = vmatpush1.bf16.msra.mxu1 %v2492_v63 }
  0x74   :  { %569 = vmatprep.subr.bf16.mxu1 %v2493_v1 }
  0x75   :  { %319 = vmatpush1.bf16.msra.mxu0 %v2453_v46  ;;  %v2538_v46 = vld [vmem:[#allocation5 + $0x2c0] ss:$8 sps:$4 sm:$0xff]  }
  0x76   :  { %798 = vmatprep.subr.bf16.mxu0 %v2504_v23  ;;  %v2576_v23 = vld [vmem:[#allocation5 + $0x384] ss:$8 sps:$4 sm:$0xff]  }
  0x77   :  { %570 = vmatpush1.bf16.msra.mxu1 %v2495_v2 }
  0x78   :  { %571 = vmatprep.subr.bf16.mxu1 %v2496_v18  ;;  %v2565_v18 = vld [vmem:[#allocation5 + $0x350] ss:$8 sps:$4 sm:$0xff]  }
  0x7b   :  { %572 = vmatpush1.bf16.msra.mxu1 %v2498_v19  ;;  %v2570_v19 = vld [vmem:[#allocation5 + $0x364] ss:$8 sps:$4 sm:$0xff]  }
  0x7c   :  { %573 = vmatprep.subr.bf16.mxu1 %v2499_v20  ;;  %v2568_v20 = vld [vmem:[#allocation5 + $0x360] ss:$8 sps:$4 sm:$0xff]  }
  0x7f   :  { %574 = vmatpush1.bf16.msra.mxu1 %v2501_v21  ;;  %v2573_v21 = vld [vmem:[#allocation5 + $0x374] ss:$8 sps:$4 sm:$0xff]  }
  0x80   :  { %1053 = vmatprep.subr.bf16.mxu1 %v2552_v8  ;;  %v2624_v8 = vld [vmem:[#allocation5 + $0x484] ss:$8 sps:$4 sm:$0xff]  }
  0xcc   :  { %v64_v3 = vpop.xlane.xlu0 %63 }
  0xcd   :  { %v66_v4 = vmul.f32 0.00390625, %v64_v3  ;;  %v2546_v3 = vld [vmem:[#allocation5 + $0x2e4] ss:$8 sps:$4 sm:$0xff]  }
  0xcf   :  { %v67_v5 = vadd.f32 1e-08, %v66_v4  ;;  %v2544_v4 = vld [vmem:[#allocation5 + $0x2e0] ss:$8 sps:$4 sm:$0xff]  }
  0xd1   :  { %2790 = vrsqrt.f32 %v67_v5  ;;  %v2549_v5 = vld [vmem:[#allocation5 + $0x2f4] ss:$8 sps:$4 sm:$0xff]  }
  0xdb   :  { %v2791_v12 = vpop.eup %2790 }
  0xdc   :  { %v76_v13 = vrot.slane %v2791_v12, %v75_v11  ;;  %v2558_v11 = vld [vmem:[#allocation5 + $0x324] ss:$8 sps:$4 sm:$0xff]   ;;  %v2556_v12 = vld [vmem:[#allocation5 + $0x320] ss:$8 sps:$4 sm:$0xff]  }
  0xde   :  { %v78_v14 = vmul.f32 %v76_v13, %v2951_v0  ;;  %v2510_v0 = vld [vmem:[#allocation5 + $0x224] ss:$8 sps:$4 sm:$0xff]   ;;  %v2561_v13 = vld [vmem:[#allocation5 + $0x334] ss:$8 sps:$4 sm:$0xff]  }
  0xe0   :  { %v80_v15 = vcombine.high %v78_v14, %v78_v14  ;;  %v82_v17 = vpack.c.bf16 %v78_v14, %v78_v14  ;;  %v2559_v14 = vld [vmem:[#allocation5 + $0x330] ss:$8 sps:$4 sm:$0xff]  }
  0xe2   :  { %v83_v16 = vpack.c.bf16 %v80_v15, %v80_v15  ;;  %v2564_v15 = vld [vmem:[#allocation5 + $0x344] ss:$8 sps:$4 sm:$0xff]  }
  0xe4   :  { %320 = vmatprep.mubr.bf16.mxu0 %v83_v16  ;;  %v2562_v16 = vld [vmem:[#allocation5 + $0x340] ss:$8 sps:$4 sm:$0xff]  }
  0xe5   :  { %321 = vmatmul.mubr.bf16.vlgmr.msra.gmra.mrb[0].mxu0 %v82_v17  ;;  %v2567_v17 = vld [vmem:[#allocation5 + $0x354] ss:$8 sps:$4 sm:$0xff]  }
  0xe6   :  { %799 = vmatpush1.bf16.msra.mxu0 %v2502_v22  ;;  %v2571_v22 = vld [vmem:[#allocation5 + $0x370] ss:$8 sps:$4 sm:$0xff]  }
  0xe7   :  { %800 = vmatprep.subr.bf16.mxu0 %v2507_v24  ;;  %v2574_v24 = vld [vmem:[#allocation5 + $0x380] ss:$8 sps:$4 sm:$0xff]  }
  0xea   :  { %801 = vmatpush1.bf16.msra.mxu0 %v2505_v25  ;;  %v2579_v25 = vld [vmem:[#allocation5 + $0x394] ss:$8 sps:$4 sm:$0xff]  }
  0xeb   :  { %802 = vmatprep.subr.bf16.mxu0 %v2510_v0  ;;  %v2577_v0 = vld [vmem:[#allocation5 + $0x390] ss:$8 sps:$4 sm:$0xff]  }
  0xee   :  { %803 = vmatpush1.bf16.msra.mxu0 %v2508_v26  ;;  %v2582_v26 = vld [vmem:[#allocation5 + $0x3a4] ss:$8 sps:$4 sm:$0xff]  }
  0xef   :  { %804 = vmatprep.subr.bf16.mxu0 %v2513_v27  ;;  %v2580_v27 = vld [vmem:[#allocation5 + $0x3a0] ss:$8 sps:$4 sm:$0xff]  }
  0xf2   :  { %805 = vmatpush1.bf16.msra.mxu0 %v2511_v28  ;;  %v2585_v28 = vld [vmem:[#allocation5 + $0x3b4] ss:$8 sps:$4 sm:$0xff]  }
  0xf3   :  { %806 = vmatprep.subr.bf16.mxu0 %v2516_v29  ;;  %v2583_v29 = vld [vmem:[#allocation5 + $0x3b0] ss:$8 sps:$4 sm:$0xff]  }
  0xf6   :  { %807 = vmatpush1.bf16.msra.mxu0 %v2514_v30  ;;  %v2588_v30 = vld [vmem:[#allocation5 + $0x3c4] ss:$8 sps:$4 sm:$0xff]  }
  0xf7   :  { %808 = vmatprep.subr.bf16.mxu0 %v2519_v31  ;;  %v2586_v31 = vld [vmem:[#allocation5 + $0x3c0] ss:$8 sps:$4 sm:$0xff]  }
  0xfa   :  { %809 = vmatpush1.bf16.msra.mxu0 %v2517_v32  ;;  %v2591_v32 = vld [vmem:[#allocation5 + $0x3d4] ss:$8 sps:$4 sm:$0xff]  }
  0xfb   :  { %810 = vmatprep.subr.bf16.mxu0 %v2522_v33  ;;  %v2589_v33 = vld [vmem:[#allocation5 + $0x3d0] ss:$8 sps:$4 sm:$0xff]  }
  0xfe   :  { %811 = vmatpush1.bf16.msra.mxu0 %v2520_v34  ;;  %v371_v34 = vld [vmem:[#allocation7 + $0x2] sm:$0x3] }
  0xff   :  { %812 = vmatprep.subr.bf16.mxu0 %v2525_v35  ;;  %v376_v35 = vrot.slane %v371_v34, %v2960_v49 }
 0x102   :  { %813 = vmatpush1.bf16.msra.mxu0 %v2523_v36  ;;  %v380_v36 = vrot.slane %v371_v34, %v2963_v50  ;;  %v2642_v34 = vld [vmem:[#allocation5 + $0x4e4] ss:$8 sps:$4 sm:$0xff]  }
 0x103   :  { %814 = vmatprep.subr.bf16.mxu0 %v2528_v37 }
 0x106   :  { %815 = vmatpush1.bf16.msra.mxu0 %v2526_v38 }
 0x107   :  { %816 = vmatprep.subr.bf16.mxu0 %v2531_v39 }
 0x10a   :  { %817 = vmatpush1.bf16.msra.mxu0 %v2529_v40 }
 0x10b   :  { %818 = vmatprep.subr.bf16.mxu0 %v2534_v41 }
 0x10e   :  { %819 = vmatpush1.bf16.msra.mxu0 %v2532_v42 }
 0x10f   :  { %820 = vmatprep.subr.bf16.mxu0 %v2537_v43 }
 0x112   :  { %821 = vmatpush1.bf16.msra.mxu0 %v2535_v44 }
 0x113   :  { %822 = vmatprep.subr.bf16.mxu0 %v2540_v45 }
 0x116   :  { %823 = vmatpush1.bf16.msra.mxu0 %v2538_v46 }
 0x117   :  { %824 = vmatprep.subr.bf16.mxu0 %v2543_v47 }
 0x11a   :  { %825 = vmatpush1.bf16.msra.mxu0 %v2541_v48 }
 0x11b   :  { %826 = vmatprep.subr.bf16.mxu0 %v2546_v3  ;;  %v2613_v3 = vld [vmem:[#allocation5 + $0x450] ss:$8 sps:$4 sm:$0xff]  }
 0x11e   :  { %827 = vmatpush1.bf16.msra.mxu0 %v2544_v4  ;;  %v2618_v4 = vld [vmem:[#allocation5 + $0x464] ss:$8 sps:$4 sm:$0xff]  }
 0x11f   :  { %828 = vmatprep.subr.bf16.mxu0 %v2549_v5  ;;  %v2616_v5 = vld [vmem:[#allocation5 + $0x460] ss:$8 sps:$4 sm:$0xff]  }
 0x122   :  { %829 = vmatpush1.bf16.msra.mxu0 %v2547_v6  ;;  %v2621_v6 = vld [vmem:[#allocation5 + $0x474] ss:$8 sps:$4 sm:$0xff]  }
 0x1b8   :  { %v322_v54 = vpop.f32.mrb[0].mxu0 }
 0x1b9   :  { %v323_v55 = vadd.f32 %v322_v54, %v121_v52  ;;  %v324_v56 = vpop.f32.mrb[1].mxu0  ;;  %v2592_v52 = vld [vmem:[#allocation5 + $0x3e0] ss:$8 sps:$4 sm:$0xff]   ;;  %v2595_v54 = vld [vmem:[#allocation5 + $0x3f0] ss:$8 sps:$4 sm:$0xff]  }
 0x1ba   :  { %v325_v57 = vadd.f32 %v324_v56, %v125_v53  ;;  %v326_v58 = vpop.f32.mrb[2].mxu0  ;;  %v2597_v53 = vld [vmem:[#allocation5 + $0x3f4] ss:$8 sps:$4 sm:$0xff]   ;;  %v2600_v56 = vld [vmem:[#allocation5 + $0x404] ss:$8 sps:$4 sm:$0xff]  }
 0x1bb   :  { %vm329_vm1 = vcmp.ge.f32.partialorder %v323_v55, 0.0  ;;  %v331_v59 = vmul.f32 0.2, %v323_v55  ;;  %v327_v60 = vpop.f32.mrb[3].mxu0  ;;  %1308 = vmatprep.subr.bf16.mxu0 %v2600_v56  ;;  %v2601_v58 = vld [vmem:[#allocation5 + $0x410] ss:$8 sps:$4 sm:$0xff]  }
 0x1bc   :  { %vm330_vm2 = vcmp.ge.f32.partialorder %v325_v57, 0.0  ;;  %v332_v61 = vmul.f32 0.2, %v325_v57  ;;  %v2604_v60 = vld [vmem:[#allocation5 + $0x420] ss:$8 sps:$4 sm:$0xff]  }
 0x1bd   :  { %v333_v62 = vsel %vm329_vm1, %v323_v55, %v331_v59  ;;  %v2598_v55 = vld [vmem:[#allocation5 + $0x400] ss:$8 sps:$4 sm:$0xff]   ;;  %v2606_v59 = vld [vmem:[#allocation5 + $0x424] ss:$8 sps:$4 sm:$0xff]  }
 0x1be   :  { %v334_v63 = vsel %vm330_vm2, %v325_v57, %v332_v61  ;;  %v335_v2 = vpack.c.bf16 %v333_v62, %v333_v62  ;;  %v2603_v57 = vld [vmem:[#allocation5 + $0x414] ss:$8 sps:$4 sm:$0xff]   ;;  %v2607_v62 = vld [vmem:[#allocation5 + $0x430] ss:$8 sps:$4 sm:$0xff]   ;;  %v2672_v56 = vld [vmem:[#allocation5 + $0x584] ss:$8 sps:$4 sm:$0xff]  }
 0x1bf   :  { %v336_v1 = vpack.c.bf16 %v334_v63, %v334_v63  ;;  %v2609_v61 = vld [vmem:[#allocation5 + $0x434] ss:$8 sps:$4 sm:$0xff]   ;;  %v2612_v63 = vld [vmem:[#allocation5 + $0x444] ss:$8 sps:$4 sm:$0xff]  }
 0x1c1   :  { %575 = vmatprep.mubr.bf16.mxu1 %v336_v1  ;;  %v2610_v1 = vld [vmem:[#allocation5 + $0x440] ss:$8 sps:$4 sm:$0xff]  }
 0x1c2   :  { %576 = vmatmul.mubr.bf16.vlgmr.msra.gmra.mrb[0].mxu1 %v335_v2  ;;  %v2615_v2 = vld [vmem:[#allocation5 + $0x454] ss:$8 sps:$4 sm:$0xff]  }
 0x1c3   :  { %1054 = vmatpush1.bf16.msra.mxu1 %v2550_v7  ;;  %v2619_v7 = vld [vmem:[#allocation5 + $0x470] ss:$8 sps:$4 sm:$0xff]  }
 0x1c4   :  { %1055 = vmatprep.subr.bf16.mxu1 %v2555_v9  ;;  %v2622_v9 = vld [vmem:[#allocation5 + $0x480] ss:$8 sps:$4 sm:$0xff]  }
 0x1c7   :  { %1056 = vmatpush1.bf16.msra.mxu1 %v2553_v10  ;;  %v2627_v10 = vld [vmem:[#allocation5 + $0x494] ss:$8 sps:$4 sm:$0xff]  }
 0x1c8   :  { %1057 = vmatprep.subr.bf16.mxu1 %v2558_v11  ;;  %v2625_v11 = vld [vmem:[#allocation5 + $0x490] ss:$8 sps:$4 sm:$0xff]  }
 0x1cb   :  { %1058 = vmatpush1.bf16.msra.mxu1 %v2556_v12  ;;  %v2630_v12 = vld [vmem:[#allocation5 + $0x4a4] ss:$8 sps:$4 sm:$0xff]  }
 0x1cc   :  { %1059 = vmatprep.subr.bf16.mxu1 %v2561_v13  ;;  %v2628_v13 = vld [vmem:[#allocation5 + $0x4a0] ss:$8 sps:$4 sm:$0xff]  }
 0x1cf   :  { %1060 = vmatpush1.bf16.msra.mxu1 %v2559_v14  ;;  %v2633_v14 = vld [vmem:[#allocation5 + $0x4b4] ss:$8 sps:$4 sm:$0xff]  }
 0x1d0   :  { %1061 = vmatprep.subr.bf16.mxu1 %v2564_v15  ;;  %v2631_v15 = vld [vmem:[#allocation5 + $0x4b0] ss:$8 sps:$4 sm:$0xff]  }
 0x1d3   :  { %1062 = vmatpush1.bf16.msra.mxu1 %v2562_v16  ;;  %v2636_v16 = vld [vmem:[#allocation5 + $0x4c4] ss:$8 sps:$4 sm:$0xff]  }
 0x1d4   :  { %1063 = vmatprep.subr.bf16.mxu1 %v2567_v17  ;;  %v2634_v17 = vld [vmem:[#allocation5 + $0x4c0] ss:$8 sps:$4 sm:$0xff]  }
 0x1d7   :  { %1064 = vmatpush1.bf16.msra.mxu1 %v2565_v18  ;;  %v2639_v18 = vld [vmem:[#allocation5 + $0x4d4] ss:$8 sps:$4 sm:$0xff]  }
 0x1d8   :  { %1065 = vmatprep.subr.bf16.mxu1 %v2570_v19  ;;  %v2637_v19 = vld [vmem:[#allocation5 + $0x4d0] ss:$8 sps:$4 sm:$0xff]  }
 0x1db   :  { %1066 = vmatpush1.bf16.msra.mxu1 %v2568_v20  ;;  %v626_v20 = vld [vmem:[#allocation7 + $0x4] sm:$0x3] }
 0x1dc   :  { %1067 = vmatprep.subr.bf16.mxu1 %v2573_v21  ;;  %v631_v21 = vrot.slane %v626_v20, %v2960_v49 }
 0x1df   :  { %1068 = vmatpush1.bf16.msra.mxu1 %v2571_v22  ;;  %v635_v22 = vrot.slane %v626_v20, %v2963_v50  ;;  %v2690_v20 = vld [vmem:[#allocation5 + $0x5e4] ss:$8 sps:$4 sm:$0xff]  }
 0x1e0   :  { %1069 = vmatprep.subr.bf16.mxu1 %v2576_v23 }
 0x1e3   :  { %1070 = vmatpush1.bf16.msra.mxu1 %v2574_v24 }
 0x1e4   :  { %1071 = vmatprep.subr.bf16.mxu1 %v2579_v25 }
 0x1e7   :  { %1072 = vmatpush1.bf16.msra.mxu1 %v2577_v0 }
 0x1e8   :  { %1073 = vmatprep.subr.bf16.mxu1 %v2582_v26 }
 0x1eb   :  { %1074 = vmatpush1.bf16.msra.mxu1 %v2580_v27 }
 0x1ec   :  { %1075 = vmatprep.subr.bf16.mxu1 %v2585_v28 }
 0x1ef   :  { %1076 = vmatpush1.bf16.msra.mxu1 %v2583_v29 }
 0x1f0   :  { %1077 = vmatprep.subr.bf16.mxu1 %v2588_v30 }
 0x1f3   :  { %1078 = vmatpush1.bf16.msra.mxu1 %v2586_v31 }
 0x1f4   :  { %1079 = vmatprep.subr.bf16.mxu1 %v2591_v32 }
 0x1f7   :  { %1080 = vmatpush1.bf16.msra.mxu1 %v2589_v33 }
 0x1f8   :  { %1081 = vmatprep.subr.bf16.mxu1 %v2594_v51  ;;  %v2661_v51 = vld [vmem:[#allocation5 + $0x550] ss:$8 sps:$4 sm:$0xff]  }
 0x1fb   :  { %1082 = vmatpush1.bf16.msra.mxu1 %v2592_v52  ;;  %v2666_v52 = vld [vmem:[#allocation5 + $0x564] ss:$8 sps:$4 sm:$0xff]  }
 0x1fc   :  { %1083 = vmatprep.subr.bf16.mxu1 %v2597_v53  ;;  %v2664_v53 = vld [vmem:[#allocation5 + $0x560] ss:$8 sps:$4 sm:$0xff]  }
 0x1ff   :  { %1084 = vmatpush1.bf16.msra.mxu1 %v2595_v54  ;;  %v2669_v54 = vld [vmem:[#allocation5 + $0x574] ss:$8 sps:$4 sm:$0xff]  }
 0x295   :  { %v577_v37 = vpop.f32.mrb[0].mxu1 }
 0x296   :  { %v578_v38 = vadd.f32 %v577_v37, %v376_v35  ;;  %v579_v39 = vpop.f32.mrb[1].mxu1  ;;  %v2640_v35 = vld [vmem:[#allocation5 + $0x4e0] ss:$8 sps:$4 sm:$0xff]   ;;  %v2643_v37 = vld [vmem:[#allocation5 + $0x4f0] ss:$8 sps:$4 sm:$0xff]  }
 0x297   :  { %v580_v40 = vadd.f32 %v579_v39, %v380_v36  ;;  %v581_v41 = vpop.f32.mrb[2].mxu1  ;;  %v2645_v36 = vld [vmem:[#allocation5 + $0x4f4] ss:$8 sps:$4 sm:$0xff]   ;;  %v2648_v39 = vld [vmem:[#allocation5 + $0x504] ss:$8 sps:$4 sm:$0xff]  }
 0x298   :  { %vm584_vm3 = vcmp.ge.f32.partialorder %v578_v38, 0.0  ;;  %v586_v42 = vmul.f32 0.2, %v578_v38  ;;  %v582_v43 = vpop.f32.mrb[3].mxu1  ;;  %1563 = vmatprep.subr.bf16.mxu1 %v2648_v39  ;;  %v2649_v41 = vld [vmem:[#allocation5 + $0x510] ss:$8 sps:$4 sm:$0xff]  }
 0x299   :  { %vm585_vm4 = vcmp.ge.f32.partialorder %v580_v40, 0.0  ;;  %v587_v44 = vmul.f32 0.2, %v580_v40  ;;  %v2652_v43 = vld [vmem:[#allocation5 + $0x520] ss:$8 sps:$4 sm:$0xff]  }
 0x29a   :  { %v588_v45 = vsel %vm584_vm3, %v578_v38, %v586_v42  ;;  %v2646_v38 = vld [vmem:[#allocation5 + $0x500] ss:$8 sps:$4 sm:$0xff]   ;;  %v2654_v42 = vld [vmem:[#allocation5 + $0x524] ss:$8 sps:$4 sm:$0xff]  }
 0x29b   :  { %v589_v46 = vsel %vm585_vm4, %v580_v40, %v587_v44  ;;  %v590_v48 = vpack.c.bf16 %v588_v45, %v588_v45  ;;  %v2651_v40 = vld [vmem:[#allocation5 + $0x514] ss:$8 sps:$4 sm:$0xff]   ;;  %v2655_v45 = vld [vmem:[#allocation5 + $0x530] ss:$8 sps:$4 sm:$0xff]   ;;  %v2720_v39 = vld [vmem:[#allocation5 + $0x684] ss:$8 sps:$4 sm:$0xff]  }
 0x29c   :  { %v591_v47 = vpack.c.bf16 %v589_v46, %v589_v46  ;;  %v2657_v44 = vld [vmem:[#allocation5 + $0x534] ss:$8 sps:$4 sm:$0xff]   ;;  %v2660_v46 = vld [vmem:[#allocation5 + $0x544] ss:$8 sps:$4 sm:$0xff]  }
 0x29e   :  { %830 = vmatprep.mubr.bf16.mxu0 %v591_v47  ;;  %v2658_v47 = vld [vmem:[#allocation5 + $0x540] ss:$8 sps:$4 sm:$0xff]  }
 0x29f   :  { %831 = vmatmul.mubr.bf16.vlgmr.msra.gmra.mrb[4].mxu0 %v590_v48  ;;  %v2663_v48 = vld [vmem:[#allocation5 + $0x554] ss:$8 sps:$4 sm:$0xff]  }
 0x2a0   :  { %1309 = vmatpush1.bf16.msra.mxu0 %v2598_v55  ;;  %v2667_v55 = vld [vmem:[#allocation5 + $0x570] ss:$8 sps:$4 sm:$0xff]  }
 0x2a1   :  { %1310 = vmatprep.subr.bf16.mxu0 %v2603_v57  ;;  %v2670_v57 = vld [vmem:[#allocation5 + $0x580] ss:$8 sps:$4 sm:$0xff]  }
 0x2a4   :  { %1311 = vmatpush1.bf16.msra.mxu0 %v2601_v58  ;;  %v2675_v58 = vld [vmem:[#allocation5 + $0x594] ss:$8 sps:$4 sm:$0xff]  }
 0x2a5   :  { %1312 = vmatprep.subr.bf16.mxu0 %v2606_v59  ;;  %v2673_v59 = vld [vmem:[#allocation5 + $0x590] ss:$8 sps:$4 sm:$0xff]  }
 0x2a8   :  { %1313 = vmatpush1.bf16.msra.mxu0 %v2604_v60  ;;  %v2678_v60 = vld [vmem:[#allocation5 + $0x5a4] ss:$8 sps:$4 sm:$0xff]  }
 0x2a9   :  { %1314 = vmatprep.subr.bf16.mxu0 %v2609_v61  ;;  %v2676_v61 = vld [vmem:[#allocation5 + $0x5a0] ss:$8 sps:$4 sm:$0xff]  }
 0x2ac   :  { %1315 = vmatpush1.bf16.msra.mxu0 %v2607_v62  ;;  %v2681_v62 = vld [vmem:[#allocation5 + $0x5b4] ss:$8 sps:$4 sm:$0xff]  }
 0x2ad   :  { %1316 = vmatprep.subr.bf16.mxu0 %v2612_v63  ;;  %v2679_v63 = vld [vmem:[#allocation5 + $0x5b0] ss:$8 sps:$4 sm:$0xff]  }
 0x2b0   :  { %1317 = vmatpush1.bf16.msra.mxu0 %v2610_v1  ;;  %v2684_v1 = vld [vmem:[#allocation5 + $0x5c4] ss:$8 sps:$4 sm:$0xff]  }
 0x2b1   :  { %1318 = vmatprep.subr.bf16.mxu0 %v2615_v2  ;;  %v2682_v2 = vld [vmem:[#allocation5 + $0x5c0] ss:$8 sps:$4 sm:$0xff]  }
 0x2b4   :  { %1319 = vmatpush1.bf16.msra.mxu0 %v2613_v3  ;;  %v2687_v3 = vld [vmem:[#allocation5 + $0x5d4] ss:$8 sps:$4 sm:$0xff]  }
 0x2b5   :  { %1320 = vmatprep.subr.bf16.mxu0 %v2618_v4  ;;  %v2685_v4 = vld [vmem:[#allocation5 + $0x5d0] ss:$8 sps:$4 sm:$0xff]  }
 0x2b8   :  { %1321 = vmatpush1.bf16.msra.mxu0 %v2616_v5  ;;  %v881_v5 = vld [vmem:[#allocation7 + $0x6] sm:$0x3] }
 0x2b9   :  { %1322 = vmatprep.subr.bf16.mxu0 %v2621_v6  ;;  %v886_v6 = vrot.slane %v881_v5, %v2960_v49 }
 0x2bc   :  { %1323 = vmatpush1.bf16.msra.mxu0 %v2619_v7  ;;  %v890_v7 = vrot.slane %v881_v5, %v2963_v50  ;;  %v2738_v5 = vld [vmem:[#allocation5 + $0x6e4] ss:$8 sps:$4 sm:$0xff]  }
 0x2bd   :  { %1324 = vmatprep.subr.bf16.mxu0 %v2624_v8 }
 0x2c0   :  { %1325 = vmatpush1.bf16.msra.mxu0 %v2622_v9 }
 0x2c1   :  { %1326 = vmatprep.subr.bf16.mxu0 %v2627_v10 }
 0x2c4   :  { %1327 = vmatpush1.bf16.msra.mxu0 %v2625_v11 }
 0x2c5   :  { %1328 = vmatprep.subr.bf16.mxu0 %v2630_v12 }
 0x2c8   :  { %1329 = vmatpush1.bf16.msra.mxu0 %v2628_v13 }
 0x2c9   :  { %1330 = vmatprep.subr.bf16.mxu0 %v2633_v14 }
 0x2cc   :  { %1331 = vmatpush1.bf16.msra.mxu0 %v2631_v15 }
 0x2cd   :  { %1332 = vmatprep.subr.bf16.mxu0 %v2636_v16 }
 0x2d0   :  { %1333 = vmatpush1.bf16.msra.mxu0 %v2634_v17 }
 0x2d1   :  { %1334 = vmatprep.subr.bf16.mxu0 %v2639_v18 }
 0x2d4   :  { %1335 = vmatpush1.bf16.msra.mxu0 %v2637_v19 }
 0x2d5   :  { %1336 = vmatprep.subr.bf16.mxu0 %v2642_v34  ;;  %v2709_v34 = vld [vmem:[#allocation5 + $0x650] ss:$8 sps:$4 sm:$0xff]  }
 0x2d8   :  { %1337 = vmatpush1.bf16.msra.mxu0 %v2640_v35  ;;  %v2714_v35 = vld [vmem:[#allocation5 + $0x664] ss:$8 sps:$4 sm:$0xff]  }
 0x2d9   :  { %1338 = vmatprep.subr.bf16.mxu0 %v2645_v36  ;;  %v2712_v36 = vld [vmem:[#allocation5 + $0x660] ss:$8 sps:$4 sm:$0xff]  }
 0x2dc   :  { %1339 = vmatpush1.bf16.msra.mxu0 %v2643_v37  ;;  %v2717_v37 = vld [vmem:[#allocation5 + $0x674] ss:$8 sps:$4 sm:$0xff]  }
 0x372   :  { %v832_v23 = vpop.f32.mrb[4].mxu0 }
 0x373   :  { %v833_v24 = vadd.f32 %v832_v23, %v631_v21  ;;  %v834_v25 = vpop.f32.mrb[5].mxu0  ;;  %v2688_v21 = vld [vmem:[#allocation5 + $0x5e0] ss:$8 sps:$4 sm:$0xff]   ;;  %v2691_v23 = vld [vmem:[#allocation5 + $0x5f0] ss:$8 sps:$4 sm:$0xff]  }
 0x374   :  { %v835_v0 = vadd.f32 %v834_v25, %v635_v22  ;;  %v836_v26 = vpop.f32.mrb[6].mxu0  ;;  %v2693_v22 = vld [vmem:[#allocation5 + $0x5f4] ss:$8 sps:$4 sm:$0xff]   ;;  %v2696_v25 = vld [vmem:[#allocation5 + $0x604] ss:$8 sps:$4 sm:$0xff]  }
 0x375   :  { %vm839_vm5 = vcmp.ge.f32.partialorder %v833_v24, 0.0  ;;  %v841_v27 = vmul.f32 0.2, %v833_v24  ;;  %v837_v28 = vpop.f32.mrb[7].mxu0  ;;  %1818 = vmatprep.subr.bf16.mxu0 %v2696_v25  ;;  %v2697_v26 = vld [vmem:[#allocation5 + $0x610] ss:$8 sps:$4 sm:$0xff]  }
 0x376   :  { %vm840_vm6 = vcmp.ge.f32.partialorder %v835_v0, 0.0  ;;  %v842_v29 = vmul.f32 0.2, %v835_v0  ;;  %v2700_v28 = vld [vmem:[#allocation5 + $0x620] ss:$8 sps:$4 sm:$0xff]  }
 0x377   :  { %v843_v30 = vsel %vm839_vm5, %v833_v24, %v841_v27  ;;  %v2694_v24 = vld [vmem:[#allocation5 + $0x600] ss:$8 sps:$4 sm:$0xff]   ;;  %v2702_v27 = vld [vmem:[#allocation5 + $0x624] ss:$8 sps:$4 sm:$0xff]  }
 0x378   :  { %v844_v31 = vsel %vm840_vm6, %v835_v0, %v842_v29  ;;  %v845_v33 = vpack.c.bf16 %v843_v30, %v843_v30  ;;  %v2699_v0 = vld [vmem:[#allocation5 + $0x614] ss:$8 sps:$4 sm:$0xff]   ;;  %v2703_v30 = vld [vmem:[#allocation5 + $0x630] ss:$8 sps:$4 sm:$0xff]   ;;  %v2768_v25 = vld [vmem:[#allocation5 + $0x784] ss:$8 sps:$4 sm:$0xff]  }
 0x379   :  { %v846_v32 = vpack.c.bf16 %v844_v31, %v844_v31  ;;  %v2705_v29 = vld [vmem:[#allocation5 + $0x634] ss:$8 sps:$4 sm:$0xff]   ;;  %v2708_v31 = vld [vmem:[#allocation5 + $0x644] ss:$8 sps:$4 sm:$0xff]  }
 0x37b   :  { %1085 = vmatprep.mubr.bf16.mxu1 %v846_v32  ;;  %v2706_v32 = vld [vmem:[#allocation5 + $0x640] ss:$8 sps:$4 sm:$0xff]  }
 0x37c   :  { %1086 = vmatmul.mubr.bf16.vlgmr.msra.gmra.mrb[4].mxu1 %v845_v33  ;;  %v2711_v33 = vld [vmem:[#allocation5 + $0x654] ss:$8 sps:$4 sm:$0xff]  }
 0x37d   :  { %1564 = vmatpush1.bf16.msra.mxu1 %v2646_v38  ;;  %v2715_v38 = vld [vmem:[#allocation5 + $0x670] ss:$8 sps:$4 sm:$0xff]  }
 0x37e   :  { %1565 = vmatprep.subr.bf16.mxu1 %v2651_v40  ;;  %v2718_v40 = vld [vmem:[#allocation5 + $0x680] ss:$8 sps:$4 sm:$0xff]  }
 0x381   :  { %1566 = vmatpush1.bf16.msra.mxu1 %v2649_v41  ;;  %v2723_v41 = vld [vmem:[#allocation5 + $0x694] ss:$8 sps:$4 sm:$0xff]  }
 0x382   :  { %1567 = vmatprep.subr.bf16.mxu1 %v2654_v42  ;;  %v2721_v42 = vld [vmem:[#allocation5 + $0x690] ss:$8 sps:$4 sm:$0xff]  }
 0x385   :  { %1568 = vmatpush1.bf16.msra.mxu1 %v2652_v43  ;;  %v2726_v43 = vld [vmem:[#allocation5 + $0x6a4] ss:$8 sps:$4 sm:$0xff]  }
 0x386   :  { %1569 = vmatprep.subr.bf16.mxu1 %v2657_v44  ;;  %v2724_v44 = vld [vmem:[#allocation5 + $0x6a0] ss:$8 sps:$4 sm:$0xff]  }
 0x389   :  { %1570 = vmatpush1.bf16.msra.mxu1 %v2655_v45  ;;  %v2729_v45 = vld [vmem:[#allocation5 + $0x6b4] ss:$8 sps:$4 sm:$0xff]  }
 0x38a   :  { %1571 = vmatprep.subr.bf16.mxu1 %v2660_v46  ;;  %v2727_v46 = vld [vmem:[#allocation5 + $0x6b0] ss:$8 sps:$4 sm:$0xff]  }
 0x38d   :  { %1572 = vmatpush1.bf16.msra.mxu1 %v2658_v47  ;;  %v2732_v47 = vld [vmem:[#allocation5 + $0x6c4] ss:$8 sps:$4 sm:$0xff]  }
 0x38e   :  { %1573 = vmatprep.subr.bf16.mxu1 %v2663_v48  ;;  %v2730_v48 = vld [vmem:[#allocation5 + $0x6c0] ss:$8 sps:$4 sm:$0xff]  }
 0x391   :  { %1574 = vmatpush1.bf16.msra.mxu1 %v2661_v51  ;;  %v2735_v51 = vld [vmem:[#allocation5 + $0x6d4] ss:$8 sps:$4 sm:$0xff]  }
 0x392   :  { %1575 = vmatprep.subr.bf16.mxu1 %v2666_v52  ;;  %v2733_v52 = vld [vmem:[#allocation5 + $0x6d0] ss:$8 sps:$4 sm:$0xff]  }
 0x395   :  { %1576 = vmatpush1.bf16.msra.mxu1 %v2664_v53  ;;  %v1136_v53 = vld [vmem:[#allocation7 + $0x8] sm:$0x3] }
 0x396   :  { %1577 = vmatprep.subr.bf16.mxu1 %v2669_v54  ;;  %v1141_v54 = vrot.slane %v1136_v53, %v2960_v49 }
 0x399   :  { %1578 = vmatpush1.bf16.msra.mxu1 %v2667_v55  ;;  %v1145_v55 = vrot.slane %v1136_v53, %v2963_v50  ;;  %v2786_v53 = vld [vmem:[#allocation5 + $0x7e4] ss:$8 sps:$4 sm:$0xff]  }
 0x39a   :  { %1579 = vmatprep.subr.bf16.mxu1 %v2672_v56 }
 0x39d   :  { %1580 = vmatpush1.bf16.msra.mxu1 %v2670_v57 }
 0x39e   :  { %1581 = vmatprep.subr.bf16.mxu1 %v2675_v58 }
 0x3a1   :  { %1582 = vmatpush1.bf16.msra.mxu1 %v2673_v59 }
 0x3a2   :  { %1583 = vmatprep.subr.bf16.mxu1 %v2678_v60 }
 0x3a5   :  { %1584 = vmatpush1.bf16.msra.mxu1 %v2676_v61 }
 0x3a6   :  { %1585 = vmatprep.subr.bf16.mxu1 %v2681_v62 }
 0x3a9   :  { %1586 = vmatpush1.bf16.msra.mxu1 %v2679_v63 }
 0x3aa   :  { %1587 = vmatprep.subr.bf16.mxu1 %v2684_v1 }
 0x3ad   :  { %1588 = vmatpush1.bf16.msra.mxu1 %v2682_v2 }
 0x3ae   :  { %1589 = vmatprep.subr.bf16.mxu1 %v2687_v3 }
 0x3b1   :  { %1590 = vmatpush1.bf16.msra.mxu1 %v2685_v4 }
 0x3b2   :  { %1591 = vmatprep.subr.bf16.mxu1 %v2690_v20  ;;  %v2757_v20 = vld [vmem:[#allocation5 + $0x750] ss:$8 sps:$4 sm:$0xff]  }
 0x3b5   :  { %1592 = vmatpush1.bf16.msra.mxu1 %v2688_v21  ;;  %v2762_v21 = vld [vmem:[#allocation5 + $0x764] ss:$8 sps:$4 sm:$0xff]  }
 0x3b6   :  { %1593 = vmatprep.subr.bf16.mxu1 %v2693_v22  ;;  %v2760_v22 = vld [vmem:[#allocation5 + $0x760] ss:$8 sps:$4 sm:$0xff]  }
 0x3b9   :  { %1594 = vmatpush1.bf16.msra.mxu1 %v2691_v23  ;;  %v2765_v23 = vld [vmem:[#allocation5 + $0x774] ss:$8 sps:$4 sm:$0xff]  }
 0x44f   :  { %v1087_v8 = vpop.f32.mrb[4].mxu1 }
 0x450   :  { %v1088_v9 = vadd.f32 %v1087_v8, %v886_v6  ;;  %v1089_v10 = vpop.f32.mrb[5].mxu1  ;;  %v2736_v6 = vld [vmem:[#allocation5 + $0x6e0] ss:$8 sps:$4 sm:$0xff]   ;;  %v2739_v8 = vld [vmem:[#allocation5 + $0x6f0] ss:$8 sps:$4 sm:$0xff]  }
 0x451   :  { %v1090_v11 = vadd.f32 %v1089_v10, %v890_v7  ;;  %v1091_v12 = vpop.f32.mrb[6].mxu1  ;;  %v2741_v7 = vld [vmem:[#allocation5 + $0x6f4] ss:$8 sps:$4 sm:$0xff]   ;;  %v2744_v10 = vld [vmem:[#allocation5 + $0x704] ss:$8 sps:$4 sm:$0xff]  }
 0x452   :  { %vm1094_vm7 = vcmp.ge.f32.partialorder %v1088_v9, 0.0  ;;  %v1096_v13 = vmul.f32 0.2, %v1088_v9  ;;  %v1092_v14 = vpop.f32.mrb[7].mxu1  ;;  %2073 = vmatprep.subr.bf16.mxu1 %v2744_v10  ;;  %v2745_v12 = vld [vmem:[#allocation5 + $0x710] ss:$8 sps:$4 sm:$0xff]  }
 0x453   :  { %vm1095_vm8 = vcmp.ge.f32.partialorder %v1090_v11, 0.0  ;;  %v1097_v15 = vmul.f32 0.2, %v1090_v11  ;;  %v2748_v14 = vld [vmem:[#allocation5 + $0x720] ss:$8 sps:$4 sm:$0xff]  }
 0x454   :  { %v1098_v16 = vsel %vm1094_vm7, %v1088_v9, %v1096_v13  ;;  %v2742_v9 = vld [vmem:[#allocation5 + $0x700] ss:$8 sps:$4 sm:$0xff]   ;;  %v2750_v13 = vld [vmem:[#allocation5 + $0x724] ss:$8 sps:$4 sm:$0xff]  }
 0x455   :  { %v1099_v17 = vsel %vm1095_vm8, %v1090_v11, %v1097_v15  ;;  %v1100_v19 = vpack.c.bf16 %v1098_v16, %v1098_v16  ;;  %v2747_v11 = vld [vmem:[#allocation5 + $0x714] ss:$8 sps:$4 sm:$0xff]   ;;  %v2751_v16 = vld [vmem:[#allocation5 + $0x730] ss:$8 sps:$4 sm:$0xff]  }
 0x456   :  { %v1101_v18 = vpack.c.bf16 %v1099_v17, %v1099_v17  ;;  %v2753_v15 = vld [vmem:[#allocation5 + $0x734] ss:$8 sps:$4 sm:$0xff]   ;;  %v2756_v17 = vld [vmem:[#allocation5 + $0x744] ss:$8 sps:$4 sm:$0xff]  }
 0x458   :  { %1340 = vmatprep.mubr.bf16.mxu0 %v1101_v18  ;;  %v2754_v18 = vld [vmem:[#allocation5 + $0x740] ss:$8 sps:$4 sm:$0xff]  }
 0x459   :  { %1341 = vmatmul.mubr.bf16.vlgmr.msra.gmra.mrb[8].mxu0 %v1100_v19  ;;  %v2759_v19 = vld [vmem:[#allocation5 + $0x754] ss:$8 sps:$4 sm:$0xff]  }
 0x45a   :  { %1819 = vmatpush1.bf16.msra.mxu0 %v2694_v24  ;;  %v2763_v24 = vld [vmem:[#allocation5 + $0x770] ss:$8 sps:$4 sm:$0xff]  }
 0x45b   :  { %1820 = vmatprep.subr.bf16.mxu0 %v2699_v0  ;;  %v2766_v0 = vld [vmem:[#allocation5 + $0x780] ss:$8 sps:$4 sm:$0xff]  }
 0x45e   :  { %1821 = vmatpush1.bf16.msra.mxu0 %v2697_v26  ;;  %v2771_v26 = vld [vmem:[#allocation5 + $0x794] ss:$8 sps:$4 sm:$0xff]  }
 0x45f   :  { %1822 = vmatprep.subr.bf16.mxu0 %v2702_v27  ;;  %v2769_v27 = vld [vmem:[#allocation5 + $0x790] ss:$8 sps:$4 sm:$0xff]  }
 0x462   :  { %1823 = vmatpush1.bf16.msra.mxu0 %v2700_v28  ;;  %v2774_v28 = vld [vmem:[#allocation5 + $0x7a4] ss:$8 sps:$4 sm:$0xff]  }
 0x463   :  { %1824 = vmatprep.subr.bf16.mxu0 %v2705_v29  ;;  %v2772_v29 = vld [vmem:[#allocation5 + $0x7a0] ss:$8 sps:$4 sm:$0xff]  }
 0x466   :  { %1825 = vmatpush1.bf16.msra.mxu0 %v2703_v30  ;;  %v2777_v30 = vld [vmem:[#allocation5 + $0x7b4] ss:$8 sps:$4 sm:$0xff]  }
 0x467   :  { %1826 = vmatprep.subr.bf16.mxu0 %v2708_v31  ;;  %v2775_v31 = vld [vmem:[#allocation5 + $0x7b0] ss:$8 sps:$4 sm:$0xff]  }
 0x46a   :  { %1827 = vmatpush1.bf16.msra.mxu0 %v2706_v32  ;;  %v2780_v32 = vld [vmem:[#allocation5 + $0x7c4] ss:$8 sps:$4 sm:$0xff]  }
 0x46b   :  { %1828 = vmatprep.subr.bf16.mxu0 %v2711_v33  ;;  %v2778_v33 = vld [vmem:[#allocation5 + $0x7c0] ss:$8 sps:$4 sm:$0xff]  }
 0x46e   :  { %1829 = vmatpush1.bf16.msra.mxu0 %v2709_v34  ;;  %v2783_v34 = vld [vmem:[#allocation5 + $0x7d4] ss:$8 sps:$4 sm:$0xff]  }
 0x46f   :  { %1830 = vmatprep.subr.bf16.mxu0 %v2714_v35  ;;  %v2781_v35 = vld [vmem:[#allocation5 + $0x7d0] ss:$8 sps:$4 sm:$0xff]  }
 0x472   :  { %1831 = vmatpush1.bf16.msra.mxu0 %v2712_v36  ;;  %v1391_v36 = vld [vmem:[#allocation7 + $0xa] sm:$0x3] }
 0x473   :  { %1832 = vmatprep.subr.bf16.mxu0 %v2717_v37  ;;  %v1396_v37 = vrot.slane %v1391_v36, %v2960_v49 }
 0x476   :  { %1833 = vmatpush1.bf16.msra.mxu0 %v2715_v38  ;;  %v1400_v38 = vrot.slane %v1391_v36, %v2963_v50 }
 0x477   :  { %1834 = vmatprep.subr.bf16.mxu0 %v2720_v39 }
 0x47a   :  { %1835 = vmatpush1.bf16.msra.mxu0 %v2718_v40 }
 0x47b   :  { %1836 = vmatprep.subr.bf16.mxu0 %v2723_v41 }
 0x47e   :  { %1837 = vmatpush1.bf16.msra.mxu0 %v2721_v42 }
 0x47f   :  { %1838 = vmatprep.subr.bf16.mxu0 %v2726_v43 }
 0x482   :  { %1839 = vmatpush1.bf16.msra.mxu0 %v2724_v44 }
 0x483   :  { %1840 = vmatprep.subr.bf16.mxu0 %v2729_v45 }
 0x486   :  { %1841 = vmatpush1.bf16.msra.mxu0 %v2727_v46 }
 0x487   :  { %1842 = vmatprep.subr.bf16.mxu0 %v2732_v47 }
 0x48a   :  { %1843 = vmatpush1.bf16.msra.mxu0 %v2730_v48 }
 0x48b   :  { %1844 = vmatprep.subr.bf16.mxu0 %v2735_v51 }
 0x48e   :  { %1845 = vmatpush1.bf16.msra.mxu0 %v2733_v52 }
 0x48f   :  { %1846 = vmatprep.subr.bf16.mxu0 %v2738_v5 }
 0x492   :  { %1847 = vmatpush1.bf16.msra.mxu0 %v2736_v6 }
 0x493   :  { %1848 = vmatprep.subr.bf16.mxu0 %v2741_v7 }
 0x496   :  { %1849 = vmatpush1.bf16.msra.mxu0 %v2739_v8 }
 0x52c   :  { %v1342_v56 = vpop.f32.mrb[8].mxu0 }
 0x52d   :  { %v1343_v57 = vadd.f32 %v1342_v56, %v1141_v54  ;;  %v1344_v58 = vpop.f32.mrb[9].mxu0  ;;  %v2784_v54 = vld [vmem:[#allocation5 + $0x7e0] ss:$8 sps:$4 sm:$0xff]   ;;  %v2787_v56 = vld [vmem:[#allocation5 + $0x7f0] ss:$8 sps:$4 sm:$0xff]  }
 0x52e   :  { %v1345_v59 = vadd.f32 %v1344_v58, %v1145_v55  ;;  %v1346_v60 = vpop.f32.mrb[10].mxu0  ;;  %v2789_v55 = vld [vmem:[#allocation5 + $0x7f4] ss:$8 sps:$4 sm:$0xff]  }
 0x52f   :  { %vm1349_vm9 = vcmp.ge.f32.partialorder %v1343_v57, 0.0  ;;  %v1351_v61 = vmul.f32 0.2, %v1343_v57  ;;  %v1347_v62 = vpop.f32.mrb[11].mxu0 }
 0x530   :  { %vm1350_vm10 = vcmp.ge.f32.partialorder %v1345_v59, 0.0  ;;  %v1352_v63 = vmul.f32 0.2, %v1345_v59 }
 0x531   :  { %v1353_v1 = vsel %vm1349_vm9, %v1343_v57, %v1351_v61  ;;  %v1646_v57 = vld [vmem:[#allocation7 + $0xc] sm:$0x3] }
 0x532   :  { %v1354_v2 = vsel %vm1350_vm10, %v1345_v59, %v1352_v63  ;;  %v1355_v4 = vpack.c.bf16 %v1353_v1, %v1353_v1  ;;  %v1651_v58 = vrot.slane %v1646_v57, %v2960_v49  ;;  %v1655_v59 = vrot.slane %v1646_v57, %v2963_v50 }
 0x533   :  { %v1356_v3 = vpack.c.bf16 %v1354_v2, %v1354_v2 }
 0x535   :  { %1595 = vmatprep.mubr.bf16.mxu1 %v1356_v3 }
 0x536   :  { %1596 = vmatmul.mubr.bf16.vlgmr.msra.gmra.mrb[8].mxu1 %v1355_v4 }
 0x537   :  { %2074 = vmatpush1.bf16.msra.mxu1 %v2742_v9  ;;  %v1901_v9 = vld [vmem:[#allocation7 + $0xe] sm:$0x3] }
 0x538   :  { %2075 = vmatprep.subr.bf16.mxu1 %v2747_v11  ;;  %v1906_v10 = vrot.slane %v1901_v9, %v2960_v49  ;;  %v1910_v11 = vrot.slane %v1901_v9, %v2963_v50 }
 0x53b   :  { %2076 = vmatpush1.bf16.msra.mxu1 %v2745_v12 }
 0x53c   :  { %2077 = vmatprep.subr.bf16.mxu1 %v2750_v13 }
 0x53f   :  { %2078 = vmatpush1.bf16.msra.mxu1 %v2748_v14 }
 0x540   :  { %2079 = vmatprep.subr.bf16.mxu1 %v2753_v15 }
 0x543   :  { %2080 = vmatpush1.bf16.msra.mxu1 %v2751_v16 }
 0x544   :  { %2081 = vmatprep.subr.bf16.mxu1 %v2756_v17 }
 0x547   :  { %2082 = vmatpush1.bf16.msra.mxu1 %v2754_v18 }
 0x548   :  { %2083 = vmatprep.subr.bf16.mxu1 %v2759_v19 }
 0x54b   :  { %2084 = vmatpush1.bf16.msra.mxu1 %v2757_v20 }
 0x54c   :  { %2085 = vmatprep.subr.bf16.mxu1 %v2762_v21 }
 0x54f   :  { %2086 = vmatpush1.bf16.msra.mxu1 %v2760_v22 }
 0x550   :  { %2087 = vmatprep.subr.bf16.mxu1 %v2765_v23 }
 0x553   :  { %2088 = vmatpush1.bf16.msra.mxu1 %v2763_v24 }
 0x554   :  { %2089 = vmatprep.subr.bf16.mxu1 %v2768_v25 }
 0x557   :  { %2090 = vmatpush1.bf16.msra.mxu1 %v2766_v0 }
 0x558   :  { %2091 = vmatprep.subr.bf16.mxu1 %v2771_v26 }
 0x55b   :  { %2092 = vmatpush1.bf16.msra.mxu1 %v2769_v27 }
 0x55c   :  { %2093 = vmatprep.subr.bf16.mxu1 %v2774_v28 }
 0x55f   :  { %2094 = vmatpush1.bf16.msra.mxu1 %v2772_v29 }
 0x560   :  { %2095 = vmatprep.subr.bf16.mxu1 %v2777_v30 }
 0x563   :  { %2096 = vmatpush1.bf16.msra.mxu1 %v2775_v31 }
 0x564   :  { %2097 = vmatprep.subr.bf16.mxu1 %v2780_v32 }
 0x567   :  { %2098 = vmatpush1.bf16.msra.mxu1 %v2778_v33 }
 0x568   :  { %2099 = vmatprep.subr.bf16.mxu1 %v2783_v34 }
 0x56b   :  { %2100 = vmatpush1.bf16.msra.mxu1 %v2781_v35 }
 0x56c   :  { %2101 = vmatprep.subr.bf16.mxu1 %v2786_v53 }
 0x56f   :  { %2102 = vmatpush1.bf16.msra.mxu1 %v2784_v54 }
 0x570   :  { %2103 = vmatprep.subr.bf16.mxu1 %v2789_v55 }
 0x573   :  { %2104 = vmatpush1.bf16.msra.mxu1 %v2787_v56 }
 0x609   :  { %v1597_v39 = vpop.f32.mrb[8].mxu1 }
 0x60a   :  { %v1598_v40 = vadd.f32 %v1597_v39, %v1396_v37  ;;  %v1599_v41 = vpop.f32.mrb[9].mxu1 }
 0x60b   :  { %v1600_v42 = vadd.f32 %v1599_v41, %v1400_v38  ;;  %v1601_v43 = vpop.f32.mrb[10].mxu1 }
 0x60c   :  { %vm1604_vm11 = vcmp.ge.f32.partialorder %v1598_v40, 0.0  ;;  %v1606_v44 = vmul.f32 0.2, %v1598_v40  ;;  %v1602_v45 = vpop.f32.mrb[11].mxu1 }
 0x60d   :  { %vm1605_vm12 = vcmp.ge.f32.partialorder %v1600_v42, 0.0  ;;  %v1607_v46 = vmul.f32 0.2, %v1600_v42 }
 0x60e   :  { %v1608_v47 = vsel %vm1604_vm11, %v1598_v40, %v1606_v44 }
 0x60f   :  { %v1609_v48 = vsel %vm1605_vm12, %v1600_v42, %v1607_v46  ;;  %v1610_v52 = vpack.c.bf16 %v1608_v47, %v1608_v47 }
 0x610   :  { %v1611_v51 = vpack.c.bf16 %v1609_v48, %v1609_v48 }
 0x612   :  { %1850 = vmatprep.mubr.bf16.mxu0 %v1611_v51 }
 0x613   :  { %1851 = vmatmul.mubr.bf16.vlgmr.msra.gmra.mrb[12].mxu0 %v1610_v52 }
 0x6e6   :  { %v1852_v60 = vpop.f32.mrb[12].mxu0 }
 0x6e7   :  { %v1853_v61 = vadd.f32 %v1852_v60, %v1651_v58  ;;  %v1854_v62 = vpop.f32.mrb[13].mxu0 }
 0x6e8   :  { %v1855_v63 = vadd.f32 %v1854_v62, %v1655_v59  ;;  %v1856_v1 = vpop.f32.mrb[14].mxu0 }
 0x6e9   :  { %vm1859_vm13 = vcmp.ge.f32.partialorder %v1853_v61, 0.0  ;;  %v1861_v2 = vmul.f32 0.2, %v1853_v61  ;;  %v1857_v3 = vpop.f32.mrb[15].mxu0 }
 0x6ea   :  { %vm1860_vm14 = vcmp.ge.f32.partialorder %v1855_v63, 0.0  ;;  %v1862_v4 = vmul.f32 0.2, %v1855_v63 }
 0x6eb   :  { %v1863_v5 = vsel %vm1859_vm13, %v1853_v61, %v1861_v2 }
 0x6ec   :  { %v1864_v6 = vsel %vm1860_vm14, %v1855_v63, %v1862_v4  ;;  %v1865_v8 = vpack.c.bf16 %v1863_v5, %v1863_v5 }
 0x6ed   :  { %v1866_v7 = vpack.c.bf16 %v1864_v6, %v1864_v6 }
 0x6ef   :  { %2105 = vmatprep.mubr.bf16.mxu1 %v1866_v7 }
 0x6f0   :  { %2106 = vmatmul.mubr.bf16.vlgmr.msra.gmra.mrb[12].mxu1 %v1865_v8 }
 0x7c3   :  { %v2107_v12 = vpop.f32.mrb[12].mxu1 }
 0x7c4   :  { %v2108_v13 = vadd.f32 %v2107_v12, %v1906_v10  ;;  %v2109_v14 = vpop.f32.mrb[13].mxu1 }
 0x7c5   :  { %v2110_v15 = vadd.f32 %v2109_v14, %v1910_v11  ;;  %v2111_v16 = vpop.f32.mrb[14].mxu1 }
 0x7c6   :  { %vm2114_vm15 = vcmp.ge.f32.partialorder %v2108_v13, 0.0  ;;  %v2116_v17 = vmul.f32 0.2, %v2108_v13  ;;  %v2112_v18 = vpop.f32.mrb[15].mxu1 }
 0x7c7   :  { %vm2115_vm0 = vcmp.ge.f32.partialorder %v2110_v15, 0.0  ;;  %v2117_v19 = vmul.f32 0.2, %v2110_v15 }
 0x7c8   :  { %v2118_v20 = vsel %vm2114_vm15, %v2108_v13, %v2116_v17 }
 0x7c9   :  { %v2119_v21 = vsel %vm2115_vm0, %v2110_v15, %v2117_v19 }
 0x7ca   :  { %v2122_v22 = vcombine.low %v2118_v20, %v2119_v21 }
 0x7cc   :  { %2124 = vst [vmem:[#allocation8] sm:$0xff] %v2122_v22 }
 0x7cd   :  { %2869 = shalt.err (!%p2866_p0)
}
 0x7ce   :  { %s2870_s27 = scalar_lea.hbm %s2996_s3, 128 }
 0x7cf   :  { %p2871_p1 = scmp.ne.s32.totalorder %s2996_s3, %s2870_s27  ;;  %p2874_p2 = scmp.lt.u32.totalorder %s2870_s27, %s2996_s3 }
 0x7d1   :  { %p2876_p3 = pnand %p2874_p2, %p2871_p1 }
 0x7d3   :  { %2879 = shalt.err (!%p2876_p3)
}
 0x7d4   :  { %2134 = dma.vmem_to_hbm [thread:$0]  %s2132_s23, 128, %s2996_s3, [#allocation4]  }
 0x7d5   :  { %2884 = dma.done.wait [#allocation4], 128  }
 0x7d6   :  { %2885 = vsyncadd [#allocation4], 4294967168 }
 0x7d7   :  { %2138 = vsyncpa [#allocation3], 1 }
 0x7d8   :  { %2139 = vsyncpa [#allocation6], 1 }
 0x7d9   :  { %2140 = vsyncpa [#allocation4], 1 }

</bundles_post_ra>
